<compile_context>
chip_gen: v7x
topology: tpu7x:2x2x1
jax: 0.10.0
libtpu: 0.0.40
codegen_flags: <defaults>
</compile_context>

<pallas_src>
import jax
import jax.numpy as jnp
from jax.experimental import pallas as pl
from jax.experimental.pallas import tpu as pltpu

# ---- backbone / problem dimensions (small, MXU/lane friendly) --------------
C_IN = 3          # input channels
T_FULL = 32       # full temporal extent (triggers Ext_Arch's split path)
HW = 16           # spatial size
TUB_T, TUB_P = 2, 4                       # tubelet size (2, 4, 4)
DP = C_IN * TUB_T * TUB_P * TUB_P         # 3*2*4*4 = 96 raw patch dim
DP_PAD = 128                              # lane-padded patch dim
D_EMB = 128       # embedding dim
D_OUT = 128       # output feature dim
TM_MAX = 32       # max samples per grid block


# ---------------------------------------------------------------------------
# Pallas kernel: fused tubelet-embed -> ReLU -> sum-pool -> head for TM samples
# ---------------------------------------------------------------------------
def fused_kernel(p_ref, we_ref, wh_ref, out_ref):
    tm, pp, dp = p_ref.shape
    # (TM*P, DP_PAD) x (DP_PAD, D_EMB) on the MXU, bf16 operands, f32 accum.
    tok = jnp.dot(p_ref[...].reshape(tm * pp, dp), we_ref[...],
                  preferred_element_type=jnp.float32)          # (TM*P, D_EMB)
    tok = jnp.maximum(tok, 0.0)                                # ReLU (f32, VPU)
    pooled = tok.reshape(tm, pp, D_EMB).sum(axis=1)            # (TM, D_EMB) f32
    # head weight already carries the 1/P (and clip-average 1/2) factor.
    out_ref[...] = jnp.dot(pooled, wh_ref[...],
                           preferred_element_type=jnp.float32
                           ).astype(out_ref.dtype)             # (TM, D_OUT)


# ---------------------------------------------------------------------------
# Glue: tubelet extraction (pure JAX reshape/transpose, no compute)
# ---------------------------------------------------------------------------
def tubelets(x):
    """(N, C, T, H, W) -> (N, P, DP) flattened tubelet patches."""
    n, c, t, h, w = x.shape
    x = x.reshape(n, c, t // TUB_T, TUB_T, h // TUB_P, TUB_P, w // TUB_P, TUB_P)
    x = x.transpose(0, 2, 4, 6, 1, 3, 5, 7)   # (N, T', H', W', C, t, p, p)
    return x.reshape(n, (t // TUB_T) * (h // TUB_P) * (w // TUB_P),
                     c * TUB_T * TUB_P * TUB_P)


def _pick_tm(n):
    """Samples per grid block: big for throughput, but >=2 blocks when N>1 so
    both v7x TensorCores get work; prefer multiples of 8 for full-sublane
    output stores."""
    if n <= 1:
        return 1
    tm = min(TM_MAX, pl.cdiv(n, 2))
    if tm >= 8:
        tm = (tm // 8) * 8
    return tm


# ---------------------------------------------------------------------------
# Wrapper: Ext_Arch.forward for model_type='videomaev2'
# ---------------------------------------------------------------------------
def ext_arch_forward(x, w_embed, w_head):
    n = x.shape[0]

    # Ext_Arch routing: if T == 32, PyTorch splits into two 16-frame clips,
    # runs the backbone on each and averages.  Because tubelet depth (2) never
    # crosses the 16-frame boundary and mean-pool + linear head are linear,
    # that average is *identical* to a single pass over the union of both
    # clips' tubelets (the 1/2 is absorbed into the 1/P_total pooling factor
    # folded into w_head below).  The T != 32 path is the same computation
    # with half as many patches, so both branches collapse to one fused pass.
    patches = tubelets(x)                       # (N, P_total, DP)
    p_total = patches.shape[1]                  # 256 if T==32 else T//2 * 16

    # Zero-pad patch dim 96 -> 128 (unmasked lanes, full MXU K); bf16 operands
    # for the dominant embed matmul (accumulation stays f32 in-kernel).
    patches = jnp.pad(patches, ((0, 0), (0, 0), (0, DP_PAD - DP)))
    patches = patches.astype(jnp.bfloat16)
    we = jnp.pad(w_embed, ((0, DP_PAD - DP), (0, 0))).astype(jnp.bfloat16)
    # Fold mean-pool 1/P (and the split-path 1/2) into the head weight (f32).
    wh = (w_head / float(p_total)).astype(jnp.float32)

    tm = _pick_tm(n)
    n_blocks = pl.cdiv(n, tm)
    n_pad = n_blocks * tm
    if n_pad != n:
        patches = jnp.pad(patches, ((0, n_pad - n), (0, 0), (0, 0)))

    out = pl.pallas_call(
        fused_kernel,
        out_shape=jax.ShapeDtypeStruct((n_pad, D_OUT), jnp.float32),
        grid_spec=pltpu.PrefetchScalarGridSpec(
            num_scalar_prefetch=0,
            grid=(n_blocks,),
            in_specs=[
                pl.BlockSpec((tm, p_total, DP_PAD), lambda i: (i, 0, 0)),
                pl.BlockSpec((DP_PAD, D_EMB), lambda i: (0, 0)),
                pl.BlockSpec((D_EMB, D_OUT), lambda i: (0, 0)),
            ],
            out_specs=pl.BlockSpec((tm, D_OUT), lambda i: (i, 0)),
        ),
        compiler_params=pltpu.CompilerParams(
            dimension_semantics=("parallel",)),
    )(patches, we, wh)
    return out[:n]


# ---------------------------------------------------------------------------
if __name__ == "__main__":
    key = jax.random.PRNGKey(0)
    kx, kw1, kw2 = jax.random.split(key, 3)

    # small deterministic inputs / params
    N = 16
    x = jax.random.normal(kx, (N, C_IN, T_FULL, HW, HW), dtype=jnp.float32)
    w_embed = jax.random.normal(kw1, (DP, D_EMB), dtype=jnp.float32) * 0.02
    w_head = jax.random.normal(kw2, (D_EMB, D_OUT), dtype=jnp.float32) * 0.02

    out = ext_arch_forward(x, w_embed, w_head)
    jax.block_until_ready(out)
    assert out.shape == (N, D_OUT)

    # (1) tight check: same math (bf16 operands, f32 accumulation) in plain JAX
    patches = jnp.pad(tubelets(x), ((0, 0), (0, 0), (0, DP_PAD - DP)))
    patches_bf = patches.astype(jnp.bfloat16)
    we_bf = jnp.pad(w_embed, ((0, DP_PAD - DP), (0, 0))).astype(jnp.bfloat16)
    p_total = patches.shape[1]
    tok = jnp.maximum(
        jnp.einsum("npd,de->npe", patches_bf, we_bf,
                   preferred_element_type=jnp.float32), 0.0)
    ref_same = tok.sum(axis=1) @ (w_head / float(p_total))
    assert jnp.allclose(out, ref_same, atol=2e-3, rtol=2e-3)

    # (2) semantic check vs. the original module's f32 split-and-average path
    def ref_backbone_f32(clip):
        p = tubelets(clip)
        t = jnp.maximum(jnp.einsum("npd,de->npe", p, w_embed), 0.0)
        return t.mean(axis=1) @ w_head

    c1, c2 = jnp.split(x, 2, axis=2)
    ref_sem = (ref_backbone_f32(c1) + ref_backbone_f32(c2)) / 2.0
    assert jnp.allclose(out, ref_sem, atol=5e-3, rtol=5e-2)

    print("KERNEL_OK")
</pallas_src>

<mosaic_0001>
module attributes {stable_mosaic.version = 11 : i64} {
  func.func @fused_kernel(%arg0: i32, %arg1: memref<8x256x128xbf16, #tpu.memory_space<vmem>>, %arg2: memref<128x128xbf16, #tpu.memory_space<vmem>>, %arg3: memref<128x128xf32, #tpu.memory_space<vmem>>, %arg4: memref<8x128xf32, #tpu.memory_space<vmem>>) attributes {dimension_semantics = [#tpu.dimension_semantics<parallel>], iteration_bounds = array<i64: 2>, scalar_prefetch = 0 : i64, scratch_operands = 0 : i64, tpu.core_type = #tpu.core_type<tc>, window_params = [{transform_indices = @transform_0, window_bounds = array<i64: 8, 256, 128>}, {pipeline_mode = #tpu.pipeline_mode<synchronous>, transform_indices = @transform_1, window_bounds = array<i64: 128, 128>}, {pipeline_mode = #tpu.pipeline_mode<synchronous>, transform_indices = @transform_2, window_bounds = array<i64: 128, 128>}, {transform_indices = @transform_3, window_bounds = array<i64: 8, 128>}]} {
    %c0 = arith.constant 0 : index
    %c0_0 = arith.constant 0 : index
    %c0_1 = arith.constant 0 : index
    %0 = vector.load %arg1[%c0, %c0_0, %c0_1] : memref<8x256x128xbf16, #tpu.memory_space<vmem>>, vector<8x256x128xbf16>
    %1 = vector.shape_cast %0 : vector<8x256x128xbf16> to vector<2048x128xbf16>
    %c0_2 = arith.constant 0 : index
    %c0_3 = arith.constant 0 : index
    %2 = vector.load %arg2[%c0_2, %c0_3] : memref<128x128xbf16, #tpu.memory_space<vmem>>, vector<128x128xbf16>
    %cst = arith.constant dense<0.000000e+00> : vector<2048x128xf32>
    %3 = tpu.matmul %1, %2, %cst {dimension_numbers = #tpu.dot_dimension_numbers<[1], [0], [0], [1], [0, 0, 1, 1], [], []>} : vector<2048x128xbf16>, vector<128x128xbf16>, vector<2048x128xf32> -> vector<2048x128xf32>
    %cst_4 = arith.constant 0.000000e+00 : f32
    %4 = vector.broadcast %cst_4 : f32 to vector<2048x128xf32>
    %5 = arith.maximumf %3, %4 : vector<2048x128xf32>
    %6 = vector.shape_cast %5 : vector<2048x128xf32> to vector<8x256x128xf32>
    %cst_5 = arith.constant dense<0.000000e+00> : vector<8x128xf32>
    %7 = vector.multi_reduction <add>, %6, %cst_5 [1] : vector<8x256x128xf32> to vector<8x128xf32>
    %c0_6 = arith.constant 0 : index
    %c0_7 = arith.constant 0 : index
    %8 = vector.load %arg3[%c0_6, %c0_7] : memref<128x128xf32, #tpu.memory_space<vmem>>, vector<128x128xf32>
    %cst_8 = arith.constant dense<0.000000e+00> : vector<8x128xf32>
    %9 = tpu.matmul %7, %8, %cst_8 {dimension_numbers = #tpu.dot_dimension_numbers<[1], [0], [0], [1], [0, 0, 1, 1], [], []>} : vector<8x128xf32>, vector<128x128xf32>, vector<8x128xf32> -> vector<8x128xf32>
    %c0_9 = arith.constant 0 : index
    %c0_10 = arith.constant 0 : index
    %10 = vector.load %arg4[%c0_9, %c0_10] : memref<8x128xf32, #tpu.memory_space<vmem>>, vector<8x128xf32>
    tpu.vector_store %arg4[%c0_9, %c0_10], %9 {strides = array<i32>} : memref<8x128xf32, #tpu.memory_space<vmem>>, vector<8x128xf32>,
    return
  }
  func.func @transform_0(%arg0: i32) -> (i32, i32, i32) {
    %c0_i32 = arith.constant 0 : i32
    %c0_i32_0 = arith.constant 0 : i32
    %c0_i32_1 = arith.constant 0 : i32
    return %arg0, %c0_i32, %c0_i32_0 : i32, i32, i32
  }
  func.func @transform_1(%arg0: i32) -> (i32, i32) {
    %c0_i32 = arith.constant 0 : i32
    %c0_i32_0 = arith.constant 0 : i32
    %c0_i32_1 = arith.constant 0 : i32
    return %c0_i32, %c0_i32_0 : i32, i32
  }
  func.func @transform_2(%arg0: i32) -> (i32, i32) {
    %c0_i32 = arith.constant 0 : i32
    %c0_i32_0 = arith.constant 0 : i32
    %c0_i32_1 = arith.constant 0 : i32
    return %c0_i32, %c0_i32_0 : i32, i32
  }
  func.func @transform_3(%arg0: i32) -> (i32, i32) {
    %c0_i32 = arith.constant 0 : i32
    %c0_i32_0 = arith.constant 0 : i32
    return %arg0, %c0_i32 : i32, i32
  }
}

</mosaic_0001>

<bundles_post_ra>
// kernel: tpu_custom_call.1
= control target key start
LH: loop header
LB: loop body
LE: loop exit
PB: predicated region body
PF: predicated region fallthrough
CT: control target
= control target key end

     0   :  { %8 = vsyncpa [#allocation3], 0  ;;  %s4672_s0 = inlined_call_operand.hbm [shape: bf16[16,256,128], index: 0, kind: input, shape index: {}]   ;;  %s4673_s1 = inlined_call_operand.hbm [shape: bf16[128,128], index: 1, kind: input, shape index: {}]   ;;  %s4674_s2 = inlined_call_operand.hbm [shape: f32[128,128], index: 2, kind: input, shape index: {}]   ;;  %s4675_s3 = inlined_call_operand.hbm [shape: f32[16,128], index: 3, kind: output, shape index: {}]  }
   0x1   :  { %10 = vsyncpa [#allocation3 + $0x1], 0 }
   0x2   :  { %11 = vsyncpa [#allocation6], 0 }
   0x3   :  { %12 = vsyncpa [#allocation4], 0 }
   0x4   :  { %14 = vsyncpa [#allocation4 + $0x1], 0  ;;  %s4186_s12 = smov 0   ;;  %s4188_s13 = smov 0  }
   0x5   :  { %s4190_s14 = smov 0   ;;  %s4192_s15 = smov 0  }
   0x6 LB: > { %s4207_s16 = sadd.s32 4294967295, %s4153_s15   ;;  %s3131_s17 = sadd.s32 4294967294, %s4153_s15   ;;  %s4153_s15 = sphi %s4192_s15, %s4695_s15   ;;  %s4149_s14 = sphi %s4190_s14, %s4694_s14   ;;  %s4145_s13 = sphi %s4188_s13, %s4693_s13   ;;  %s4141_s12 = sphi %s4186_s12, %s4692_s12  }
   0x7   : > { %p40_p0 = scmp.ne.s32.totalorder %s4145_s13, %s4141_s12  ;;  %p4676_p1 = scmp.eq.s32.totalorder %s4207_s16, 0 }
   0x8   : > { %p112_p3 = scmp.eq.s32.totalorder %s3131_s17, 1  ;;  %p3132_p5 = scmp.ge.s32.totalorder %s4153_s15, 1 }
   0x9   : > { %p4216_p4 = por %p4676_p1, %p40_p0  ;;  %p119_p7 = scmp.lt.s32.totalorder %s4153_s15, 3 }
   0xa   : > { %p4221_p6 = por %p112_p3, %p40_p0  ;;  %s4155_s21 = smov [#allocation5]  }
   0xb   : > { %s4679_s18 = scalar_select %p4216_p4, 1, 0 }
   0xc   : > { %s4680_s19 = scalar_select %p4221_p6, 1, 0 }
   0xd   : > { %p4226_p8 = pnand %p3132_p5, %p119_p7  ;;  %s131_s22 = sshll.u32 %s4155_s21, 4  ;;  %s4230_s22 = int_to_ptr.vmem [resolvable:$true] %s131_s22 }
   0xe   : > { %s4156_s24 = smov [#allocation7]   ;;  %s3997_s28 = scalar_lea.hbm %s4673_s1, 1024 }
   0xf   : > { %p3799_p9 = pneg %p4226_p8  ;;  %s144_s25 = sshll.u32 %s4156_s24, 4  ;;  %s4241_s25 = int_to_ptr.vmem [resolvable:$true] %s144_s25 }
  0x10   : > { %p3998_p12 = scmp.ne.s32.totalorder %s4673_s1, %s3997_s28  ;;  %p4004_p5 = scmp.lt.u32.totalorder %s3997_s28, %s4673_s1 }
  0x11   : > { %p4237_p11 = pnand %p3799_p9, %p4676_p1 }
  0x13   : > { %p3999_p13 = pneg %p4237_p11 }
  0x15   : > { %p4000_p0 = pnand %p3999_p13, %p3998_p12 }
  0x17   : > { %p4001_p3 = pneg %p4000_p0 }
  0x19   : > { %p4006_p7 = pnand %p4004_p5, %p4001_p3 }
  0x1b   : > { %4009 = shalt.err (!%p4006_p7)
}
  0x1c   : > { %s4010_s6 = scalar_lea.vmem %s4230_s22, 1024  ;;  %p4018_p2 = scmp.lt.s32.totalorder %s4230_s22, %s4230_s22 }
  0x1d   : > { %p4011_p9 = scmp.ne.s32.totalorder %s4230_s22, %s4010_s6  ;;  %p4019_p12 = scmp.lt.s32.totalorder %s4010_s6, %s4010_s6 }
  0x1f   : > { %p4013_p10 = pnand %p4011_p9, %p3999_p13  ;;  %p4020_p0 = por %p4019_p12, %p4018_p2 }
  0x21   : > { %p4014_p1 = pneg %p4013_p10 }
  0x23   : > { %p4021_p6 = pnand %p4020_p0, %p4014_p1 }
  0x25   : > { %4024 = shalt.err (!%p4021_p6)
}
  0x26   : > { %s4157_s7 = smov 64   ;;  %s4158_s8 = smov 4  }
  0x27   : > { %3802 = dma.hbm_to_vmem [thread:$0]  (!%p4237_p11), %s4673_s1, 1024, %s4230_s22, [#allocation6], %s4157_s7, %s4157_s7, %s4158_s8  }
  0x28   : > { %s4025_s21 = scalar_lea.hbm %s4674_s2, 2048 }
  0x29   : > { %p4026_p1 = scmp.ne.s32.totalorder %s4674_s2, %s4025_s21  ;;  %p4032_p10 = scmp.lt.u32.totalorder %s4025_s21, %s4674_s2 }
  0x2b   : > { %p4028_p2 = pnand %p4026_p1, %p3999_p13 }
  0x2d   : > { %p4029_p6 = pneg %p4028_p2 }
  0x2f   : > { %p4034_p3 = pnand %p4032_p10, %p4029_p6 }
  0x31   : > { %4037 = shalt.err (!%p4034_p3)
}
  0x32   : > { %s4038_s22 = scalar_lea.vmem %s4241_s25, 2048  ;;  %p4046_p12 = scmp.lt.s32.totalorder %s4241_s25, %s4241_s25 }
  0x33   : > { %p4039_p5 = scmp.ne.s32.totalorder %s4241_s25, %s4038_s22  ;;  %p4047_p0 = scmp.lt.s32.totalorder %s4038_s22, %s4038_s22 }
  0x35   : > { %p4041_p7 = pnand %p4039_p5, %p3999_p13  ;;  %p4048_p1 = por %p4047_p0, %p4046_p12 }
  0x37   : > { %p4042_p9 = pneg %p4041_p7 }
  0x39   : > { %p4049_p2 = pnand %p4048_p1, %p4042_p9 }
  0x3b   : > { %4052 = shalt.err (!%p4049_p2)
}
  0x3c   : > { %s4159_s29 = smov 128   ;;  %s4160_s30 = smov 8  }
  0x3d   : > { %3805 = dma.hbm_to_vmem [thread:$0]  (!%p4237_p11), %s4674_s2, 2048, %s4241_s25, [#allocation6], %s4159_s29, %s4159_s29, %s4160_s30  }
  0x3e   : > { %s4299_s6 = sadd.s32 1, %s4153_s15   ;;  %s27_s10 = sadd.s32 1, %s4149_s14 }
  0x3f   : > { %s24_s9 = ssub.s32 %s4153_s15, %s4299_s6  ;;  %p34_p6 = scmp.ne.s32.totalorder %s4149_s14, %s4145_s13 }
  0x40   : > { %p25_p13 = scmp.eq.s32.totalorder %s24_s9, 0  ;;  %p35_p10 = scmp.eq.s32.totalorder %s4153_s15, 0 }
  0x41   : > { %p4683_p5 = scmp.eq.s32.totalorder %s4207_s16, 1  ;;  %p3816_p9 = scmp.lt.s32.totalorder %s4153_s15, 2 }
  0x42   : > { %s4308_s11 = scalar_select %p25_p13, %s4149_s14, %s27_s10  }
  0x43   : > { %p36_p3 = por %p35_p10, %p34_p6  ;;  %p4312_p7 = por %p4683_p5, %p34_p6 }
  0x44   : > { %s158_s23 = sand.u32 1, %s4149_s14   ;;  %s3286_s25 = sshll.u32 %s4153_s15, 14 }
  0x45   : > { %s4684_s17 = scalar_select %p4312_p7, 1, 0 }
  0x46   : > { %s3136_s21 = sshll.u32 %s158_s23, 10  ;;  %s4322_s27 = scalar_lea.hbm %s4672_s0, %s3286_s25 }
  0x47   : > { %s162_s28 = scalar_lea.vmem [#allocation2], %s3136_s21  ;;  %p4326_p11 = pnand %p3816_p9, %p36_p3 }
  0x48   : > { %s170_s22 = sshll.u32 %s162_s28, 4  ;;  %s4330_s30 = scalar_lea.sflag [#allocation3], %s158_s23  ;;  %s4324_s22 = int_to_ptr.vmem [resolvable:$true] %s170_s22 }
  0x49   : > { %s4053_s4 = scalar_lea.hbm %s4322_s27, 16384  ;;  %p4055_p0 = pneg %p4326_p11 }
  0x4a   : > { %p4054_p12 = scmp.ne.s32.totalorder %s4322_s27, %s4053_s4  ;;  %s4058_s10 = scalar_lea.hbm %s4672_s0, 32768 }
  0x4b   : > { %p4059_p13 = scmp.lt.u32.totalorder %s4322_s27, %s4672_s0  ;;  %p4060_p6 = scmp.lt.u32.totalorder %s4058_s10, %s4053_s4 }
  0x4c   : > { %p4056_p1 = pnand %p4055_p0, %p4054_p12  ;;  %p4062_p3 = scmp.lt.u32.totalorder %s4053_s4, %s4322_s27 }
  0x4d   : > { %p4061_p10 = por %p4060_p6, %p4059_p13 }
  0x4e   : > { %p4057_p2 = pneg %p4056_p1 }
  0x4f   : > { %p4063_p5 = por %p4062_p3, %p4061_p10 }
  0x51   : > { %p4064_p9 = pnand %p4063_p5, %p4057_p2 }
  0x53   : > { %4067 = shalt.err (!%p4064_p9)
}
  0x54   : > { %s4068_s23 = scalar_lea.vmem %s4324_s22, 16384  ;;  %s4161_s24 = smov [#allocation2]  }
  0x55   : > { %p4069_p12 = scmp.ne.s32.totalorder %s4324_s22, %s4068_s23  ;;  %s4073_s26 = sshll.u32 %s4161_s24, 4  ;;  %s4074_s26 = int_to_ptr.vmem [resolvable:$false] %s4073_s26 }
  0x56   : > { %s4075_s28 = scalar_lea.vmem %s4074_s26, 32768  ;;  %p4076_p4 = scmp.lt.s32.totalorder %s4324_s22, %s4074_s26 }
  0x57   : > { %p4071_p1 = pnand %p4069_p12, %p4055_p0  ;;  %p4077_p13 = scmp.lt.s32.totalorder %s4075_s28, %s4068_s23 }
  0x59   : > { %p4072_p7 = pneg %p4071_p1  ;;  %p4078_p6 = por %p4077_p13, %p4076_p4 }
  0x5b   : > { %p4079_p10 = pnand %p4078_p6, %p4072_p7 }
  0x5d   : > { %4082 = shalt.err (!%p4079_p10)
}
  0x5e   : > { %3809 = dma.hbm_to_vmem [thread:$0]  (!%p4326_p11), %s4322_s27, 16384, %s4324_s22, %s4330_s30, %s4157_s7, %s4157_s7, %s4158_s8  }
  0x5f   : > { %182 = sbr.rel (%p4226_p8) target bundleno = 916 (0x394), region = 32  ;;  %s4364_s4 = sand.u32 (!%p4226_p8), 1, %s4145_s13  }
  0x60   : > { %s3141_s5 = sshll.u32 (!%p4226_p8), %s4364_s4, 10  ;;  %s185_s9 = scalar_lea.sflag (!%p4226_p8), [#allocation3], %s4364_s4 }
  0x61   : > { %s4368_s10 = scalar_lea.vmem (!%p4226_p8), [#allocation2], %s3141_s5  ;;  %p4686_p4 = scmp.ne.s32.totalorder (!%p4226_p8), %s4679_s18, 0 }
  0x66   : > { %4128 = dma.done.wait (%p4686_p4), %s185_s9, 16384  }
  0x67   : > { %4130 = vsyncadd (%p4686_p4), %s185_s9, 4294950912  ;;  %p4687_p7 = scmp.eq.s32.totalorder %s4207_s16, 0 }
  0x69   : > { %4132 = dma.done.wait (%p4687_p7), [#allocation6], 3072   ;;  %p4688_p8 = pmov %p4687_p7 }
  0x6a   : > { %v3861_v0 = vld [vmem:[#allocation5] sm:$0xff]   ;;  %v3862_v1 = vld [vmem:[#allocation5 + $0x8] sm:$0xff]   ;;  %v3863_v2 = vld [vmem:[#allocation5 + $0x10] sm:$0xff]   ;;  %vm2942_vm0 = vcmask 1041409   ;;  %vm4163_vm1 = vmmov 0   ;;  %vm2944_vm2 = vcmask 1042434  }
  0x6b   : > { %4134 = vsyncadd (%p4688_p8), [#allocation6], 4294964224  ;;  %3440 = vmatprep.subr.bf16.mxu0 %v3861_v0  ;;  %3771 = vmatprep.subr.bf16.mxu1 %v3861_v0  ;;  %v3864_v3 = vld [vmem:[#allocation5 + $0x18] sm:$0xff]   ;;  %v3869_v4 = vld [vmem:[%s4368_s10] sm:$0xff]   ;;  %vm2946_vm3 = vcmask 1043459   ;;  %vm2948_vm4 = vcmask 1044484  }
  0x6c   : > { %3441 = vmatpush3.bf16.msra.mxu0 %v3861_v0  ;;  %3779 = vmatpush3.bf16.msra.mxu1 %v3861_v0  ;;  %v3865_v5 = vld [vmem:[#allocation5 + $0x20] sm:$0xff]   ;;  %v3866_v6 = vld [vmem:[#allocation5 + $0x28] sm:$0xff]   ;;  %v3867_v7 = vld [vmem:[#allocation5 + $0x30] sm:$0xff]   ;;  %vm2950_vm5 = vcmask 1045509   ;;  %vm2952_vm6 = vcmask 1046534   ;;  %vm2954_vm7 = vcmask 1047559  }
  0x6d   : > { %3442 = vmatprep.subr.bf16.mxu0 %v3862_v1  ;;  %3772 = vmatprep.subr.bf16.mxu1 %v3862_v1  ;;  %v3868_v8 = vld [vmem:[#allocation5 + $0x38] sm:$0xff]   ;;  %v3885_v9 = vld [vmem:[%s4368_s10 + $0x210] sm:$0xff]   ;;  %v3870_v10 = vld [vmem:[%s4368_s10 + $0x8] sm:$0xff]   ;;  %s3144_s18 = sshll.u32 %s4364_s4, 3  ;;  %s3282_s8 = sshll.u32 %s4207_s16, 7 }
  0x6e   : > { %3456 = vmatprep.mubr.bf16.mxu0 %v3869_v4  ;;  %3588 = vmatprep.mubr.bf16.mxu1 %v3885_v9  ;;  %v3871_v11 = vld [vmem:[%s4368_s10 + $0x10] sm:$0xff]   ;;  %v3886_v12 = vld [vmem:[%s4368_s10 + $0x218] sm:$0xff]   ;;  %v3889_v13 = vld [vmem:[%s4368_s10 + $0x220] sm:$0xff]   ;;  %s218_s20 = scalar_lea.vmem [#allocation8], %s3144_s18  ;;  %s4630_s29 = scalar_lea.hbm %s4675_s3, %s3282_s8 }
  0x6f   : > { %v3872_v14 = vld [vmem:[%s4368_s10 + $0x18] sm:$0xff]   ;;  %v3873_v15 = vld [vmem:[%s4368_s10 + $0x20] sm:$0xff]   ;;  %v3890_v16 = vld [vmem:[%s4368_s10 + $0x228] sm:$0xff]   ;;  %s3042_s7 = sshll.u32 %s218_s20, 4  ;;  %s3029_s30 = scalar_lea.sflag [#allocation4], %s4364_s4  ;;  %s4625_s7 = int_to_ptr.vmem [resolvable:$true] %s3042_s7 }
  0x70   : > { %3443 = vmatpush3.bf16.msra.mxu0 %v3862_v1  ;;  %3780 = vmatpush3.bf16.msra.mxu1 %v3862_v1  ;;  %v3893_v17 = vld [vmem:[%s4368_s10 + $0x230] sm:$0xff]   ;;  %v3874_v18 = vld [vmem:[%s4368_s10 + $0x28] sm:$0xff]   ;;  %v3894_v20 = vld [vmem:[%s4368_s10 + $0x238] sm:$0xff]   ;;  %s4083_s21 = scalar_lea.vmem %s4625_s7, 128  ;;  %p4689_p0 = scmp.ne.s32.totalorder %s4684_s17, 0 }
  0x71   : > { %3444 = vmatprep.subr.bf16.mxu0 %v3863_v2  ;;  %3773 = vmatprep.subr.bf16.mxu1 %v3863_v2  ;;  %v3875_v19 = vld [vmem:[%s4368_s10 + $0x30] sm:$0xff]   ;;  %v3897_v21 = vld [vmem:[%s4368_s10 + $0x240] sm:$0xff]   ;;  %v3876_v22 = vld [vmem:[%s4368_s10 + $0x38] sm:$0xff]   ;;  %p4084_p11 = scmp.ne.s32.totalorder %s4625_s7, %s4083_s21  ;;  %s4165_s16 = smov [#allocation8]  }
  0x72   : > { %v3877_v23 = vld [vmem:[%s4368_s10 + $0x40] sm:$0xff]   ;;  %v3898_v24 = vld [vmem:[%s4368_s10 + $0x248] sm:$0xff]   ;;  %v3901_v25 = vld [vmem:[%s4368_s10 + $0x250] sm:$0xff]   ;;  %s4087_s25 = sshll.u32 %s4165_s16, 4  ;;  %s4088_s25 = int_to_ptr.vmem [resolvable:$false] %s4087_s25 }
  0x73   : > { %v3878_v26 = vld [vmem:[%s4368_s10 + $0x48] sm:$0xff]   ;;  %v3879_v27 = vld [vmem:[%s4368_s10 + $0x50] sm:$0xff]   ;;  %v3902_v28 = vld [vmem:[%s4368_s10 + $0x258] sm:$0xff]   ;;  %p4085_p2 = pnand %p4084_p11, %p4689_p0  ;;  %s4089_s23 = scalar_lea.vmem %s4088_s25, 256 }
  0x74   : > { %3445 = vmatpush3.bf16.msra.mxu0 %v3863_v2  ;;  %3781 = vmatpush3.bf16.msra.mxu1 %v3863_v2  ;;  %v3905_v29 = vld [vmem:[%s4368_s10 + $0x260] sm:$0xff]   ;;  %v3880_v30 = vld [vmem:[%s4368_s10 + $0x58] sm:$0xff]   ;;  %v3906_v32 = vld [vmem:[%s4368_s10 + $0x268] sm:$0xff]   ;;  %p4090_p5 = scmp.lt.s32.totalorder %s4625_s7, %s4088_s25  ;;  %p4091_p9 = scmp.lt.s32.totalorder %s4089_s23, %s4083_s21 }
  0x75   : > { %3446 = vmatprep.subr.bf16.mxu0 %v3864_v3  ;;  %3774 = vmatprep.subr.bf16.mxu1 %v3864_v3  ;;  %v3881_v31 = vld [vmem:[%s4368_s10 + $0x60] sm:$0xff]   ;;  %v3909_v33 = vld [vmem:[%s4368_s10 + $0x270] sm:$0xff]   ;;  %v3882_v34 = vld [vmem:[%s4368_s10 + $0x68] sm:$0xff]   ;;  %p4086_p3 = pneg %p4085_p2 }
  0x76   : > { %v3883_v35 = vld [vmem:[%s4368_s10 + $0x70] sm:$0xff]   ;;  %v3910_v36 = vld [vmem:[%s4368_s10 + $0x278] sm:$0xff]   ;;  %v3913_v37 = vld [vmem:[%s4368_s10 + $0x280] sm:$0xff]   ;;  %p4092_p12 = por %p4091_p9, %p4090_p5 }
  0x77   : > { %v3884_v38 = vld [vmem:[%s4368_s10 + $0x78] sm:$0xff]   ;;  %v3887_v39 = vld [vmem:[%s4368_s10 + $0x80] sm:$0xff]   ;;  %v3914_v40 = vld [vmem:[%s4368_s10 + $0x288] sm:$0xff]  }
  0x78   : > { %3447 = vmatpush3.bf16.msra.mxu0 %v3864_v3  ;;  %3782 = vmatpush3.bf16.msra.mxu1 %v3864_v3  ;;  %v3917_v41 = vld [vmem:[%s4368_s10 + $0x290] sm:$0xff]   ;;  %v3888_v42 = vld [vmem:[%s4368_s10 + $0x88] sm:$0xff]   ;;  %v3918_v43 = vld [vmem:[%s4368_s10 + $0x298] sm:$0xff]   ;;  %p4093_p1 = pnand %p4092_p12, %p4086_p3 }
  0x79   : > { %3448 = vmatprep.subr.bf16.mxu0 %v3865_v5  ;;  %3775 = vmatprep.subr.bf16.mxu1 %v3865_v5  ;;  %v3891_v44 = vld [vmem:[%s4368_s10 + $0x90] sm:$0xff]   ;;  %v3921_v45 = vld [vmem:[%s4368_s10 + $0x2a0] sm:$0xff]   ;;  %v3892_v46 = vld [vmem:[%s4368_s10 + $0x98] sm:$0xff]  }
  0x7a   : > { %v3922_v47 = vld [vmem:[%s4368_s10 + $0x2a8] sm:$0xff]   ;;  %v3895_v48 = vld [vmem:[%s4368_s10 + $0xa0] sm:$0xff]   ;;  %v3925_v49 = vld [vmem:[%s4368_s10 + $0x2b0] sm:$0xff]  }
  0x7b   : > { %v3896_v50 = vld [vmem:[%s4368_s10 + $0xa8] sm:$0xff]   ;;  %v3926_v51 = vld [vmem:[%s4368_s10 + $0x2b8] sm:$0xff]   ;;  %v3899_v52 = vld [vmem:[%s4368_s10 + $0xb0] sm:$0xff]  }
  0x7c   : > { %3449 = vmatpush3.bf16.msra.mxu0 %v3865_v5  ;;  %3783 = vmatpush3.bf16.msra.mxu1 %v3865_v5  ;;  %v3929_v53 = vld [vmem:[%s4368_s10 + $0x2c0] sm:$0xff]   ;;  %v3900_v54 = vld [vmem:[%s4368_s10 + $0xb8] sm:$0xff]   ;;  %v3930_v56 = vld [vmem:[%s4368_s10 + $0x2c8] sm:$0xff]  }
  0x7d   : > { %3450 = vmatprep.subr.bf16.mxu0 %v3866_v6  ;;  %3776 = vmatprep.subr.bf16.mxu1 %v3866_v6  ;;  %v3903_v55 = vld [vmem:[%s4368_s10 + $0xc0] sm:$0xff]   ;;  %v3933_v57 = vld [vmem:[%s4368_s10 + $0x2d0] sm:$0xff]   ;;  %v3904_v58 = vld [vmem:[%s4368_s10 + $0xc8] sm:$0xff]  }
  0x7e   : > { %v3934_v59 = vld [vmem:[%s4368_s10 + $0x2d8] sm:$0xff]   ;;  %v3907_v60 = vld [vmem:[%s4368_s10 + $0xd0] sm:$0xff]   ;;  %v3937_v61 = vld [vmem:[%s4368_s10 + $0x2e0] sm:$0xff]  }
  0x7f   : > { %v3908_v62 = vld [vmem:[%s4368_s10 + $0xd8] sm:$0xff]   ;;  %v3938_v63 = vld [vmem:[%s4368_s10 + $0x2e8] sm:$0xff]   ;;  %v3911_v0 = vld [vmem:[%s4368_s10 + $0xe0] sm:$0xff]  }
  0x80   : > { %3451 = vmatpush3.bf16.msra.mxu0 %v3866_v6  ;;  %3784 = vmatpush3.bf16.msra.mxu1 %v3866_v6  ;;  %v3941_v1 = vld [vmem:[%s4368_s10 + $0x2f0] sm:$0xff]   ;;  %v3912_v2 = vld [vmem:[%s4368_s10 + $0xe8] sm:$0xff]   ;;  %v3942_v3 = vld [vmem:[%s4368_s10 + $0x2f8] sm:$0xff]  }
  0x81   : > { %3452 = vmatprep.subr.bf16.mxu0 %v3867_v7  ;;  %3777 = vmatprep.subr.bf16.mxu1 %v3867_v7  ;;  %v3915_v4 = vld [vmem:[%s4368_s10 + $0xf0] sm:$0xff]   ;;  %v3945_v5 = vld [vmem:[%s4368_s10 + $0x300] sm:$0xff]   ;;  %v3916_v6 = vld [vmem:[%s4368_s10 + $0xf8] sm:$0xff]  }
  0x82   : > { %v3949_v9 = vld [vmem:[%s4368_s10 + $0x310] sm:$0xff]  }
  0x84   : > { %3453 = vmatpush3.bf16.msra.mxu0 %v3867_v7  ;;  %3785 = vmatpush3.bf16.msra.mxu1 %v3867_v7  ;;  %v3946_v7 = vld [vmem:[%s4368_s10 + $0x308] sm:$0xff]  }
  0x85   : > { %3454 = vmatprep.subr.bf16.mxu0 %v3868_v8  ;;  %3778 = vmatprep.subr.bf16.mxu1 %v3868_v8 }
  0x88   : > { %3455 = vmatpush3.bf16.msra.mxu0 %v3868_v8  ;;  %3786 = vmatpush3.bf16.msra.mxu1 %v3868_v8  ;;  %v3919_v8 = vld [vmem:[%s4368_s10 + $0x100] sm:$0xff]  }
  0x8b   : > { %3457 = vmatmul.mubr.bf16.vlgmr.msra.gmra.mrb[0].mxu0 %v3870_v10  ;;  %3589 = vmatmul.mubr.bf16.vlgmr.msra.gmra.mrb[0].mxu1 %v3886_v12  ;;  %v3920_v10 = vld [vmem:[%s4368_s10 + $0x108] sm:$0xff]   ;;  %v3923_v12 = vld [vmem:[%s4368_s10 + $0x110] sm:$0xff]  }
  0x8c   : > { %3460 = vmatprep.mubr.bf16.mxu0 %v3871_v11  ;;  %3592 = vmatprep.mubr.bf16.mxu1 %v3889_v13  ;;  %v3950_v11 = vld [vmem:[%s4368_s10 + $0x318] sm:$0xff]   ;;  %v3953_v13 = vld [vmem:[%s4368_s10 + $0x320] sm:$0xff]  }
  0x93   : > { %3461 = vmatmul.mubr.bf16.gmra.mrb[4].mxu0 %v3872_v14  ;;  %3593 = vmatmul.mubr.bf16.gmra.mrb[4].mxu1 %v3890_v16  ;;  %v3924_v14 = vld [vmem:[%s4368_s10 + $0x118] sm:$0xff]   ;;  %v3927_v16 = vld [vmem:[%s4368_s10 + $0x120] sm:$0xff]  }
  0x94   : > { %3464 = vmatprep.mubr.bf16.mxu0 %v3873_v15  ;;  %3596 = vmatprep.mubr.bf16.mxu1 %v3893_v17  ;;  %v3954_v15 = vld [vmem:[%s4368_s10 + $0x328] sm:$0xff]   ;;  %v3957_v17 = vld [vmem:[%s4368_s10 + $0x330] sm:$0xff]  }
  0x9b   : > { %3465 = vmatmul.mubr.bf16.gmra.mrb[8].mxu0 %v3874_v18  ;;  %3597 = vmatmul.mubr.bf16.gmra.mrb[8].mxu1 %v3894_v20  ;;  %v3928_v18 = vld [vmem:[%s4368_s10 + $0x128] sm:$0xff]   ;;  %v3931_v20 = vld [vmem:[%s4368_s10 + $0x130] sm:$0xff]  }
  0x9c   : > { %3468 = vmatprep.mubr.bf16.mxu0 %v3875_v19  ;;  %3600 = vmatprep.mubr.bf16.mxu1 %v3897_v21  ;;  %v3958_v19 = vld [vmem:[%s4368_s10 + $0x338] sm:$0xff]   ;;  %v3961_v21 = vld [vmem:[%s4368_s10 + $0x340] sm:$0xff]  }
  0xa3   : > { %3469 = vmatmul.mubr.bf16.gmra.mrb[12].mxu0 %v3876_v22  ;;  %3601 = vmatmul.mubr.bf16.gmra.mrb[12].mxu1 %v3898_v24  ;;  %v3932_v22 = vld [vmem:[%s4368_s10 + $0x138] sm:$0xff]   ;;  %v3935_v24 = vld [vmem:[%s4368_s10 + $0x140] sm:$0xff]  }
  0xa4   : > { %3472 = vmatprep.mubr.bf16.mxu0 %v3877_v23  ;;  %3604 = vmatprep.mubr.bf16.mxu1 %v3901_v25  ;;  %v3962_v23 = vld [vmem:[%s4368_s10 + $0x348] sm:$0xff]   ;;  %v3965_v25 = vld [vmem:[%s4368_s10 + $0x350] sm:$0xff]  }
  0xab   : > { %3473 = vmatmul.mubr.bf16.gmra.mrb[16].mxu0 %v3878_v26  ;;  %3605 = vmatmul.mubr.bf16.gmra.mrb[16].mxu1 %v3902_v28  ;;  %v3936_v26 = vld [vmem:[%s4368_s10 + $0x148] sm:$0xff]   ;;  %v3939_v28 = vld [vmem:[%s4368_s10 + $0x150] sm:$0xff]  }
  0xac   : > { %3476 = vmatprep.mubr.bf16.mxu0 %v3879_v27  ;;  %3608 = vmatprep.mubr.bf16.mxu1 %v3905_v29  ;;  %v3966_v27 = vld [vmem:[%s4368_s10 + $0x358] sm:$0xff]   ;;  %v3969_v29 = vld [vmem:[%s4368_s10 + $0x360] sm:$0xff]  }
  0xb3   : > { %3477 = vmatmul.mubr.bf16.gmra.mrb[20].mxu0 %v3880_v30  ;;  %3609 = vmatmul.mubr.bf16.gmra.mrb[20].mxu1 %v3906_v32  ;;  %v3940_v30 = vld [vmem:[%s4368_s10 + $0x158] sm:$0xff]   ;;  %v3943_v32 = vld [vmem:[%s4368_s10 + $0x160] sm:$0xff]  }
  0xb4   : > { %3480 = vmatprep.mubr.bf16.mxu0 %v3881_v31  ;;  %3612 = vmatprep.mubr.bf16.mxu1 %v3909_v33  ;;  %v3970_v31 = vld [vmem:[%s4368_s10 + $0x368] sm:$0xff]   ;;  %v3973_v33 = vld [vmem:[%s4368_s10 + $0x370] sm:$0xff]  }
  0xbb   : > { %3481 = vmatmul.mubr.bf16.gmra.mrb[24].mxu0 %v3882_v34  ;;  %3613 = vmatmul.mubr.bf16.gmra.mrb[24].mxu1 %v3910_v36  ;;  %v3944_v34 = vld [vmem:[%s4368_s10 + $0x168] sm:$0xff]   ;;  %v3947_v36 = vld [vmem:[%s4368_s10 + $0x170] sm:$0xff]  }
  0xbc   : > { %3484 = vmatprep.mubr.bf16.mxu0 %v3883_v35  ;;  %3616 = vmatprep.mubr.bf16.mxu1 %v3913_v37  ;;  %v3974_v35 = vld [vmem:[%s4368_s10 + $0x378] sm:$0xff]   ;;  %v3977_v37 = vld [vmem:[%s4368_s10 + $0x380] sm:$0xff]  }
  0xc3   : > { %3485 = vmatmul.mubr.bf16.gmra.mrb[28].mxu0 %v3884_v38  ;;  %3617 = vmatmul.mubr.bf16.gmra.mrb[28].mxu1 %v3914_v40  ;;  %v2918_v38 = vld [vmem:[#allocation7] sm:$0xff]  ;;  %v3948_v40 = vld [vmem:[%s4368_s10 + $0x178] sm:$0xff]  }
  0xc4   : > { %3488 = vmatprep.mubr.bf16.mxu0 %v3887_v39  ;;  %3620 = vmatprep.mubr.bf16.mxu1 %v3917_v41  ;;  %v2919_v39 = vld [vmem:[#allocation7 + $0x8] sm:$0xff] }
  0xc5   : > { %v3978_v41 = vld [vmem:[%s4368_s10 + $0x388] sm:$0xff]  }
  0xcb   : > { %3489 = vmatmul.mubr.bf16.gmra.mrb[32].mxu0 %v3888_v42  ;;  %3621 = vmatmul.mubr.bf16.gmra.mrb[32].mxu1 %v3918_v43  ;;  %v4162_v42 = vmov 0.0|0.0   ;;  %v3748_v43 = vpack.c.bf16 %v2919_v39, %v2918_v38  ;;  %v3994_v38 = vld [vmem:[%s4368_s10 + $0x3e8] sm:$0xff]  }
  0xcc   : > { %3492 = vmatprep.mubr.bf16.mxu0 %v3891_v44  ;;  %3624 = vmatprep.mubr.bf16.mxu1 %v3921_v45  ;;  %v3951_v44 = vld [vmem:[%s4368_s10 + $0x180] sm:$0xff]   ;;  %v3981_v45 = vld [vmem:[%s4368_s10 + $0x390] sm:$0xff]  }
  0xcd   : > { %3747 = vmatprep.subr.bf16.mxu1 %v4162_v42 }
  0xce   : > { %3749 = vmatpush3.bf16.msra.mxu1 %v3748_v43 }
  0xcf   : > { %3750 = vmatprep.subr.bf16.mxu1 %v4162_v42 }
  0xd3   : > { %3493 = vmatmul.mubr.bf16.gmra.mrb[36].mxu0 %v3892_v46  ;;  %3625 = vmatmul.mubr.bf16.gmra.mrb[36].mxu1 %v3922_v47  ;;  %v3952_v46 = vld [vmem:[%s4368_s10 + $0x188] sm:$0xff]   ;;  %v3982_v47 = vld [vmem:[%s4368_s10 + $0x398] sm:$0xff]  }
  0xd4   : > { %3496 = vmatprep.mubr.bf16.mxu0 %v3895_v48  ;;  %3628 = vmatprep.mubr.bf16.mxu1 %v3925_v49  ;;  %v3955_v48 = vld [vmem:[%s4368_s10 + $0x190] sm:$0xff]   ;;  %v3985_v49 = vld [vmem:[%s4368_s10 + $0x3a0] sm:$0xff]  }
  0xdb   : > { %3497 = vmatmul.mubr.bf16.gmra.mrb[40].mxu0 %v3896_v50  ;;  %3629 = vmatmul.mubr.bf16.gmra.mrb[40].mxu1 %v3926_v51  ;;  %v3956_v50 = vld [vmem:[%s4368_s10 + $0x198] sm:$0xff]   ;;  %v3986_v51 = vld [vmem:[%s4368_s10 + $0x3a8] sm:$0xff]  }
  0xdc   : > { %3500 = vmatprep.mubr.bf16.mxu0 %v3899_v52  ;;  %3632 = vmatprep.mubr.bf16.mxu1 %v3929_v53  ;;  %v3959_v52 = vld [vmem:[%s4368_s10 + $0x1a0] sm:$0xff]   ;;  %v3987_v53 = vld [vmem:[%s4368_s10 + $0x3b0] sm:$0xff]  }
  0xe3   : > { %3501 = vmatmul.mubr.bf16.gmra.mrb[44].mxu0 %v3900_v54  ;;  %3633 = vmatmul.mubr.bf16.gmra.mrb[44].mxu1 %v3930_v56  ;;  %v3960_v54 = vld [vmem:[%s4368_s10 + $0x1a8] sm:$0xff]   ;;  %v3963_v56 = vld [vmem:[%s4368_s10 + $0x1b0] sm:$0xff]  }
  0xe4   : > { %3504 = vmatprep.mubr.bf16.mxu0 %v3903_v55  ;;  %3636 = vmatprep.mubr.bf16.mxu1 %v3933_v57  ;;  %v3988_v55 = vld [vmem:[%s4368_s10 + $0x3b8] sm:$0xff]   ;;  %v3989_v57 = vld [vmem:[%s4368_s10 + $0x3c0] sm:$0xff]  }
  0xeb   : > { %3505 = vmatmul.mubr.bf16.gmra.mrb[48].mxu0 %v3904_v58  ;;  %3637 = vmatmul.mubr.bf16.gmra.mrb[48].mxu1 %v3934_v59 }
  0xec   : > { %3508 = vmatprep.mubr.bf16.mxu0 %v3907_v60  ;;  %3640 = vmatprep.mubr.bf16.mxu1 %v3937_v61  ;;  %v3964_v61 = vld [vmem:[%s4368_s10 + $0x1b8] sm:$0xff]  }
  0xf3   : > { %3509 = vmatmul.mubr.bf16.gmra.mrb[52].mxu0 %v3908_v62  ;;  %3641 = vmatmul.mubr.bf16.gmra.mrb[52].mxu1 %v3938_v63  ;;  %v3990_v62 = vld [vmem:[%s4368_s10 + $0x3c8] sm:$0xff]  }
  0xf4   : > { %3512 = vmatprep.mubr.bf16.mxu0 %v3911_v0  ;;  %3644 = vmatprep.mubr.bf16.mxu1 %v3941_v1  ;;  %v3967_v1 = vld [vmem:[%s4368_s10 + $0x1c0] sm:$0xff]  }
  0xfb   : > { %3513 = vmatmul.mubr.bf16.gmra.mrb[56].mxu0 %v3912_v2  ;;  %3645 = vmatmul.mubr.bf16.gmra.mrb[56].mxu1 %v3942_v3  ;;  %v3991_v3 = vld [vmem:[%s4368_s10 + $0x3d0] sm:$0xff]  }
  0xfc   : > { %3516 = vmatprep.mubr.bf16.mxu0 %v3915_v4  ;;  %3648 = vmatprep.mubr.bf16.mxu1 %v3945_v5 }
 0x103   : > { %3517 = vmatmul.mubr.bf16.gmra.mrb[60].mxu0 %v3916_v6  ;;  %3649 = vmatmul.mubr.bf16.gmra.mrb[60].mxu1 %v3946_v7 }
 0x104   : > { %3520 = vmatprep.mubr.bf16.mxu0 %v3919_v8  ;;  %3652 = vmatprep.mubr.bf16.mxu1 %v3949_v9 }
 0x10b   : > { %3521 = vmatmul.mubr.bf16.gmra.mrb[64].mxu0 %v3920_v10  ;;  %3653 = vmatmul.mubr.bf16.gmra.mrb[64].mxu1 %v3950_v11 }
 0x10c   : > { %3524 = vmatprep.mubr.bf16.mxu0 %v3923_v12  ;;  %3656 = vmatprep.mubr.bf16.mxu1 %v3953_v13 }
 0x113   : > { %3525 = vmatmul.mubr.bf16.gmra.mrb[68].mxu0 %v3924_v14  ;;  %3657 = vmatmul.mubr.bf16.gmra.mrb[68].mxu1 %v3954_v15  ;;  %v3968_v15 = vld [vmem:[%s4368_s10 + $0x1c8] sm:$0xff]  }
 0x114   : > { %3528 = vmatprep.mubr.bf16.mxu0 %v3927_v16  ;;  %3660 = vmatprep.mubr.bf16.mxu1 %v3957_v17  ;;  %v3992_v16 = vld [vmem:[%s4368_s10 + $0x3d8] sm:$0xff]  }
 0x11b   : > { %3529 = vmatmul.mubr.bf16.gmra.mrb[72].mxu0 %v3928_v18  ;;  %3661 = vmatmul.mubr.bf16.gmra.mrb[72].mxu1 %v3958_v19 }
 0x11c   : > { %3532 = vmatprep.mubr.bf16.mxu0 %v3931_v20  ;;  %3664 = vmatprep.mubr.bf16.mxu1 %v3961_v21  ;;  %v3971_v21 = vld [vmem:[%s4368_s10 + $0x1d0] sm:$0xff]  }
 0x123   : > { %3533 = vmatmul.mubr.bf16.gmra.mrb[76].mxu0 %v3932_v22  ;;  %3665 = vmatmul.mubr.bf16.gmra.mrb[76].mxu1 %v3962_v23  ;;  %v3993_v23 = vld [vmem:[%s4368_s10 + $0x3e0] sm:$0xff]  }
 0x124   : > { %3536 = vmatprep.mubr.bf16.mxu0 %v3935_v24  ;;  %3668 = vmatprep.mubr.bf16.mxu1 %v3965_v25 }
 0x12b   : > { %3537 = vmatmul.mubr.bf16.gmra.mrb[80].mxu0 %v3936_v26  ;;  %3669 = vmatmul.mubr.bf16.gmra.mrb[80].mxu1 %v3966_v27 }
 0x12c   : > { %3540 = vmatprep.mubr.bf16.mxu0 %v3939_v28  ;;  %3672 = vmatprep.mubr.bf16.mxu1 %v3969_v29 }
 0x133   : > { %3541 = vmatmul.mubr.bf16.gmra.mrb[84].mxu0 %v3940_v30  ;;  %3673 = vmatmul.mubr.bf16.gmra.mrb[84].mxu1 %v3970_v31 }
 0x134   : > { %3544 = vmatprep.mubr.bf16.mxu0 %v3943_v32  ;;  %3676 = vmatprep.mubr.bf16.mxu1 %v3973_v33 }
 0x13b   : > { %3545 = vmatmul.mubr.bf16.gmra.mrb[88].mxu0 %v3944_v34  ;;  %3677 = vmatmul.mubr.bf16.gmra.mrb[88].mxu1 %v3974_v35  ;;  %v2920_v34 = vld [vmem:[#allocation7 + $0x10] sm:$0xff]  ;;  %v2921_v35 = vld [vmem:[#allocation7 + $0x18] sm:$0xff] }
 0x13c   : > { %3548 = vmatprep.mubr.bf16.mxu0 %v3947_v36  ;;  %3680 = vmatprep.mubr.bf16.mxu1 %v3977_v37  ;;  %v3972_v37 = vld [vmem:[%s4368_s10 + $0x1d8] sm:$0xff]  }
 0x143   : > { %3549 = vmatmul.mubr.bf16.gmra.mrb[92].mxu0 %v3948_v40  ;;  %3681 = vmatmul.mubr.bf16.gmra.mrb[92].mxu1 %v3978_v41  ;;  %v3751_v40 = vpack.c.bf16 %v2921_v35, %v2920_v34 }
 0x144   : > { %3552 = vmatprep.mubr.bf16.mxu0 %v3951_v44  ;;  %3684 = vmatprep.mubr.bf16.mxu1 %v3981_v45  ;;  %v3975_v45 = vld [vmem:[%s4368_s10 + $0x1e0] sm:$0xff]  }
 0x145   : > { %3752 = vmatpush3.bf16.msra.mxu1 %v3751_v40 }
 0x146   : > { %3753 = vmatprep.subr.bf16.mxu1 %v4162_v42 }
 0x14b   : > { %3553 = vmatmul.mubr.bf16.gmra.mrb[96].mxu0 %v3952_v46  ;;  %3685 = vmatmul.mubr.bf16.gmra.mrb[96].mxu1 %v3982_v47  ;;  %v3995_v47 = vld [vmem:[%s4368_s10 + $0x3f0] sm:$0xff]  }
 0x14c   : > { %3556 = vmatprep.mubr.bf16.mxu0 %v3955_v48  ;;  %3688 = vmatprep.mubr.bf16.mxu1 %v3985_v49 }
 0x153   : > { %3557 = vmatmul.mubr.bf16.gmra.mrb[100].mxu0 %v3956_v50  ;;  %3689 = vmatmul.mubr.bf16.gmra.mrb[100].mxu1 %v3986_v51 }
 0x154   : > { %3560 = vmatprep.mubr.bf16.mxu0 %v3959_v52  ;;  %3692 = vmatprep.mubr.bf16.mxu1 %v3987_v53 }
 0x15b   : > { %3561 = vmatmul.mubr.bf16.gmra.mrb[104].mxu0 %v3960_v54  ;;  %3693 = vmatmul.mubr.bf16.gmra.mrb[104].mxu1 %v3988_v55 }
 0x15c   : > { %3564 = vmatprep.mubr.bf16.mxu0 %v3963_v56  ;;  %3696 = vmatprep.mubr.bf16.mxu1 %v3989_v57 }
 0x15e   : > { %v3458_v58 = vpop.f32.mrb[0].mxu0  ;;  %v4490_v59 = vpop.f32.mrb[0].mxu1 }
 0x15f   : > { %v1343_v60 = vpop.f32.mrb[1].mxu0  ;;  %v4494_v63 = vpop.f32.mrb[1].mxu1  ;;  %v2368_v8 = vmax.f32 %v3458_v58, 0.0 }
 0x160   : > { %v3459_v0 = vpop.f32.mrb[2].mxu0  ;;  %v4497_v2 = vpop.f32.mrb[2].mxu1  ;;  %v2366_v6 = vmax.f32 %v1343_v60, 0.0  ;;  %v3976_v60 = vld [vmem:[%s4368_s10 + $0x1e8] sm:$0xff]  }
 0x161   : > { %v1346_v4 = vpop.f32.mrb[3].mxu0  ;;  %v4500_v5 = vpop.f32.mrb[3].mxu1  ;;  %v2369_v10 = vmax.f32 %v3459_v0, 0.0 }
 0x162   : > { %v2367_v7 = vmax.f32 %v1346_v4, 0.0  ;;  %v3979_v4 = vld [vmem:[%s4368_s10 + $0x1f0] sm:$0xff]  }
 0x163   : > { %3565 = vmatmul.mubr.bf16.gmra.mrb[108].mxu0 %v3964_v61  ;;  %3697 = vmatmul.mubr.bf16.gmra.mrb[108].mxu1 %v3990_v62  ;;  %v3996_v61 = vld [vmem:[%s4368_s10 + $0x3f8] sm:$0xff]  }
 0x164   : > { %v2622_v9 = vadd.f32 %v2367_v7, %v2366_v6  ;;  %3568 = vmatprep.mubr.bf16.mxu0 %v3967_v1  ;;  %3700 = vmatprep.mubr.bf16.mxu1 %v3991_v3 }
 0x166   : > { %v2623_v11 = vadd.f32 %v2622_v9, %v2368_v8  ;;  %v3462_v12 = vpop.f32.mrb[4].mxu0  ;;  %v4502_v13 = vpop.f32.mrb[4].mxu1 }
 0x167   : > { %v1359_v14 = vpop.f32.mrb[5].mxu0  ;;  %v4506_v17 = vpop.f32.mrb[5].mxu1  ;;  %v2372_v28 = vmax.f32 %v3462_v12, 0.0  ;;  %v2923_v12 = vld [vmem:[#allocation7 + $0x28] sm:$0xff] }
 0x168   : > { %v2370_v18 = vmax.f32 %v1359_v14, 0.0  ;;  %v2624_v19 = vadd.f32 %v2623_v11, %v2369_v10  ;;  %v3463_v20 = vpop.f32.mrb[6].mxu0  ;;  %v4509_v22 = vpop.f32.mrb[6].mxu1  ;;  %v2922_v11 = vld [vmem:[#allocation7 + $0x20] sm:$0xff] }
 0x169   : > { %v1362_v24 = vpop.f32.mrb[7].mxu0  ;;  %v4512_v25 = vpop.f32.mrb[7].mxu1  ;;  %v2373_v30 = vmax.f32 %v3463_v20, 0.0  ;;  %v3754_v14 = vpack.c.bf16 %v2923_v12, %v2922_v11 }
 0x16a   : > { %v2625_v26 = vadd.f32 %v2624_v19, %v2370_v18  ;;  %v2371_v27 = vmax.f32 %v1362_v24, 0.0  ;;  %v3980_v24 = vld [vmem:[%s4368_s10 + $0x1f8] sm:$0xff]  }
 0x16b   : > { %3569 = vmatmul.mubr.bf16.gmra.mrb[112].mxu0 %v3968_v15  ;;  %3701 = vmatmul.mubr.bf16.gmra.mrb[112].mxu1 %v3992_v16 }
 0x16c   : > { %v2626_v29 = vadd.f32 %v2625_v26, %v2371_v27  ;;  %3572 = vmatprep.mubr.bf16.mxu0 %v3971_v21  ;;  %3704 = vmatprep.mubr.bf16.mxu1 %v3993_v23 }
 0x16d   : > { %3755 = vmatpush3.bf16.msra.mxu1 %v3754_v14 }
 0x16e   : > { %v2627_v31 = vadd.f32 %v2626_v29, %v2372_v28  ;;  %v3466_v32 = vpop.f32.mrb[8].mxu0  ;;  %v4514_v33 = vpop.f32.mrb[8].mxu1  ;;  %3756 = vmatprep.subr.bf16.mxu1 %v4162_v42 }
 0x16f   : > { %v1375_v36 = vpop.f32.mrb[9].mxu0  ;;  %v4518_v39 = vpop.f32.mrb[9].mxu1  ;;  %v2376_v52 = vmax.f32 %v3466_v32, 0.0 }
 0x170   : > { %v2374_v41 = vmax.f32 %v1375_v36, 0.0  ;;  %v2628_v43 = vadd.f32 %v2627_v31, %v2373_v30  ;;  %v3467_v44 = vpop.f32.mrb[10].mxu0  ;;  %v4521_v46 = vpop.f32.mrb[10].mxu1  ;;  %v3983_v30 = vld [vmem:[%s4368_s10 + $0x200] sm:$0xff]  }
 0x171   : > { %v1378_v48 = vpop.f32.mrb[11].mxu0  ;;  %v4524_v49 = vpop.f32.mrb[11].mxu1  ;;  %v2377_v54 = vmax.f32 %v3467_v44, 0.0 }
 0x172   : > { %v2629_v50 = vadd.f32 %v2628_v43, %v2374_v41  ;;  %v2375_v51 = vmax.f32 %v1378_v48, 0.0 }
 0x173   : > { %3573 = vmatmul.mubr.bf16.gmra.mrb[116].mxu0 %v3972_v37  ;;  %3705 = vmatmul.mubr.bf16.gmra.mrb[116].mxu1 %v3994_v38 }
 0x174   : > { %v2630_v53 = vadd.f32 %v2629_v50, %v2375_v51  ;;  %3576 = vmatprep.mubr.bf16.mxu0 %v3975_v45  ;;  %3708 = vmatprep.mubr.bf16.mxu1 %v3995_v47  ;;  %v3984_v47 = vld [vmem:[%s4368_s10 + $0x208] sm:$0xff]  }
 0x176   : > { %v2631_v55 = vadd.f32 %v2630_v53, %v2376_v52  ;;  %v3470_v56 = vpop.f32.mrb[12].mxu0  ;;  %v4527_v57 = vpop.f32.mrb[12].mxu1 }
 0x177   : > { %v1391_v58 = vpop.f32.mrb[13].mxu0  ;;  %v4531_v62 = vpop.f32.mrb[13].mxu1  ;;  %v2380_v15 = vmax.f32 %v3470_v56, 0.0 }
 0x178   : > { %v2378_v0 = vmax.f32 %v1391_v58, 0.0  ;;  %v2632_v1 = vadd.f32 %v2631_v55, %v2377_v54  ;;  %v3471_v3 = vpop.f32.mrb[14].mxu0  ;;  %v4534_v6 = vpop.f32.mrb[14].mxu1 }
 0x179   : > { %v1394_v7 = vpop.f32.mrb[15].mxu0  ;;  %v4536_v8 = vpop.f32.mrb[15].mxu1  ;;  %v2381_v18 = vmax.f32 %v3471_v3, 0.0 }
 0x17a   : > { %v2633_v9 = vadd.f32 %v2632_v1, %v2378_v0  ;;  %v2379_v10 = vmax.f32 %v1394_v7, 0.0 }
 0x17b   : > { %3577 = vmatmul.mubr.bf16.gmra.mrb[120].mxu0 %v3976_v60  ;;  %3709 = vmatmul.mubr.bf16.gmra.mrb[120].mxu1 %v3996_v61 }
 0x17c   : > { %v2634_v16 = vadd.f32 %v2633_v9, %v2379_v10  ;;  %3580 = vmatprep.mubr.bf16.mxu0 %v3979_v4 }
 0x17e   : > { %v2635_v19 = vadd.f32 %v2634_v16, %v2380_v15  ;;  %v3474_v20 = vpop.f32.mrb[16].mxu0  ;;  %v4538_v21 = vpop.f32.mrb[16].mxu1 }
 0x17f   : > { %v1407_v23 = vpop.f32.mrb[17].mxu0  ;;  %v4542_v26 = vpop.f32.mrb[17].mxu1  ;;  %v2384_v37 = vmax.f32 %v3474_v20, 0.0 }
 0x180   : > { %v2382_v27 = vmax.f32 %v1407_v23, 0.0  ;;  %v2636_v28 = vadd.f32 %v2635_v19, %v2381_v18  ;;  %v3475_v29 = vpop.f32.mrb[18].mxu0  ;;  %v4545_v31 = vpop.f32.mrb[18].mxu1 }
 0x181   : > { %v1410_v32 = vpop.f32.mrb[19].mxu0  ;;  %v4547_v34 = vpop.f32.mrb[19].mxu1  ;;  %v2385_v40 = vmax.f32 %v3475_v29, 0.0 }
 0x182   : > { %v2637_v35 = vadd.f32 %v2636_v28, %v2382_v27  ;;  %v2383_v36 = vmax.f32 %v1410_v32, 0.0 }
 0x183   : > { %3581 = vmatmul.mubr.bf16.gmra.mrb[124].mxu0 %v3980_v24 }
 0x184   : > { %v2638_v38 = vadd.f32 %v2637_v35, %v2383_v36  ;;  %3584 = vmatprep.mubr.bf16.mxu0 %v3983_v30 }
 0x186   : > { %v2639_v41 = vadd.f32 %v2638_v38, %v2384_v37  ;;  %v3478_v43 = vpop.f32.mrb[20].mxu0  ;;  %v4549_v44 = vpop.f32.mrb[20].mxu1 }
 0x187   : > { %v1423_v45 = vpop.f32.mrb[21].mxu0  ;;  %v4552_v48 = vpop.f32.mrb[21].mxu1  ;;  %v2388_v60 = vmax.f32 %v3478_v43, 0.0 }
 0x188   : > { %v2386_v50 = vmax.f32 %v1423_v45, 0.0  ;;  %v2640_v51 = vadd.f32 %v2639_v41, %v2385_v40  ;;  %v3479_v52 = vpop.f32.mrb[22].mxu0  ;;  %v4554_v53 = vpop.f32.mrb[22].mxu1 }
 0x189   : > { %v1426_v54 = vpop.f32.mrb[23].mxu0  ;;  %v4556_v55 = vpop.f32.mrb[23].mxu1  ;;  %v2389_v0 = vmax.f32 %v3479_v52, 0.0  ;;  %v2924_v52 = vld [vmem:[#allocation7 + $0x30] sm:$0xff] }
 0x18a   : > { %v2641_v56 = vadd.f32 %v2640_v51, %v2386_v50  ;;  %v2387_v58 = vmax.f32 %v1426_v54, 0.0  ;;  %v2925_v54 = vld [vmem:[#allocation7 + $0x38] sm:$0xff] }
 0x18b   : > { %3585 = vmatmul.mubr.bf16.gmra.mrb[128].mxu0 %v3984_v47 }
 0x18c   : > { %v2642_v61 = vadd.f32 %v2641_v56, %v2387_v58  ;;  %v3757_v56 = vpack.c.bf16 %v2925_v54, %v2924_v52 }
 0x18e   : > { %v2643_v1 = vadd.f32 %v2642_v61, %v2388_v60  ;;  %v3482_v3 = vpop.f32.mrb[24].mxu0  ;;  %v4558_v4 = vpop.f32.mrb[24].mxu1  ;;  %3758 = vmatpush3.bf16.msra.mxu1 %v3757_v56 }
 0x18f   : > { %v1439_v7 = vpop.f32.mrb[25].mxu0  ;;  %v4560_v9 = vpop.f32.mrb[25].mxu1  ;;  %v2392_v20 = vmax.f32 %v3482_v3, 0.0  ;;  %3759 = vmatprep.subr.bf16.mxu1 %v4162_v42 }
 0x190   : > { %v2390_v10 = vmax.f32 %v1439_v7, 0.0  ;;  %v2644_v11 = vadd.f32 %v2643_v1, %v2389_v0  ;;  %v3483_v12 = vpop.f32.mrb[26].mxu0  ;;  %v4562_v14 = vpop.f32.mrb[26].mxu1 }
 0x191   : > { %v1442_v15 = vpop.f32.mrb[27].mxu0  ;;  %v4564_v16 = vpop.f32.mrb[27].mxu1  ;;  %v2393_v24 = vmax.f32 %v3483_v12, 0.0 }
 0x192   : > { %v2645_v18 = vadd.f32 %v2644_v11, %v2390_v10  ;;  %v2391_v19 = vmax.f32 %v1442_v15, 0.0 }
 0x194   : > { %v2646_v23 = vadd.f32 %v2645_v18, %v2391_v19 }
 0x196   : > { %v2647_v27 = vadd.f32 %v2646_v23, %v2392_v20  ;;  %v3486_v28 = vpop.f32.mrb[28].mxu0  ;;  %v3618_v29 = vpop.f32.mrb[28].mxu1 }
 0x197   : > { %v1455_v30 = vpop.f32.mrb[29].mxu0  ;;  %v1983_v32 = vpop.f32.mrb[29].mxu1  ;;  %v2528_v50 = vmax.f32 %v3618_v29, 0.0  ;;  %v2396_v58 = vmax.f32 %v3486_v28, 0.0 }
 0x198   : > { %v2394_v35 = vmax.f32 %v1455_v30, 0.0  ;;  %v2648_v36 = vadd.f32 %v2647_v27, %v2393_v24  ;;  %v3487_v37 = vpop.f32.mrb[30].mxu0  ;;  %v2526_v38 = vmax.f32 %v1983_v32, 0.0  ;;  %v3619_v40 = vpop.f32.mrb[30].mxu1 }
 0x199   : > { %v1458_v41 = vpop.f32.mrb[31].mxu0  ;;  %v1986_v43 = vpop.f32.mrb[31].mxu1  ;;  %v2529_v61 = vmax.f32 %v3619_v40, 0.0  ;;  %v2397_v1 = vmax.f32 %v3487_v37, 0.0 }
 0x19a   : > { %v2649_v45 = vadd.f32 %v2648_v36, %v2394_v35  ;;  %v2395_v47 = vmax.f32 %v1458_v41, 0.0  ;;  %v2527_v51 = vmax.f32 %v1986_v43, 0.0 }
 0x19c   : > { %v2650_v60 = vadd.f32 %v2649_v45, %v2395_v47  ;;  %v2807_v0 = vadd.f32 %v2527_v51, %v2526_v38 }
 0x19e   : > { %v2651_v3 = vadd.f32 %v2650_v60, %v2396_v58  ;;  %v3490_v7 = vpop.f32.mrb[32].mxu0  ;;  %v2808_v10 = vadd.f32 %v2807_v0, %v2528_v50  ;;  %v3622_v11 = vpop.f32.mrb[32].mxu1 }
 0x19f   : > { %v1471_v12 = vpop.f32.mrb[33].mxu0  ;;  %v1999_v15 = vpop.f32.mrb[33].mxu1  ;;  %v2532_v28 = vmax.f32 %v3622_v11, 0.0  ;;  %v2400_v37 = vmax.f32 %v3490_v7, 0.0 }
 0x1a0   : > { %v4567_v18 = vadd.f32 %v2651_v3, %v2397_v1  ;;  %v3491_v19 = vpop.f32.mrb[34].mxu0  ;;  %v2530_v20 = vmax.f32 %v1999_v15, 0.0  ;;  %v2809_v23 = vadd.f32 %v2808_v10, %v2529_v61  ;;  %v3623_v24 = vpop.f32.mrb[34].mxu1  ;;  %v2398_v30 = vmax.f32 %v1471_v12, 0.0 }
 0x1a1   : > { %v1474_v27 = vpop.f32.mrb[35].mxu0  ;;  %v2002_v29 = vpop.f32.mrb[35].mxu1  ;;  %v2533_v41 = vmax.f32 %v3623_v24, 0.0  ;;  %v2401_v43 = vmax.f32 %v3491_v19, 0.0 }
 0x1a2   : > { %v2399_v32 = vmax.f32 %v1474_v27, 0.0  ;;  %v2810_v35 = vadd.f32 %v2809_v23, %v2530_v20  ;;  %v2531_v36 = vmax.f32 %v2002_v29, 0.0 }
 0x1a4   : > { %v2659_v38 = vadd.f32 %v2399_v32, %v2398_v30  ;;  %v2811_v40 = vadd.f32 %v2810_v35, %v2531_v36 }
 0x1a6   : > { %v2660_v45 = vadd.f32 %v2659_v38, %v2400_v37  ;;  %v3494_v47 = vpop.f32.mrb[36].mxu0  ;;  %v2812_v50 = vadd.f32 %v2811_v40, %v2532_v28  ;;  %v3626_v51 = vpop.f32.mrb[36].mxu1 }
 0x1a7   : > { %v1487_v52 = vpop.f32.mrb[37].mxu0  ;;  %v2015_v54 = vpop.f32.mrb[37].mxu1  ;;  %v2536_v15 = vmax.f32 %v3626_v51, 0.0  ;;  %v2404_v19 = vmax.f32 %v3494_v47, 0.0 }
 0x1a8   : > { %v2402_v56 = vmax.f32 %v1487_v52, 0.0  ;;  %v2661_v58 = vadd.f32 %v2660_v45, %v2401_v43  ;;  %v3495_v60 = vpop.f32.mrb[38].mxu0  ;;  %v2534_v61 = vmax.f32 %v2015_v54, 0.0  ;;  %v3627_v0 = vpop.f32.mrb[38].mxu1  ;;  %v2813_v3 = vadd.f32 %v2812_v50, %v2533_v41 }
 0x1a9   : > { %v1490_v1 = vpop.f32.mrb[39].mxu0  ;;  %v2018_v10 = vpop.f32.mrb[39].mxu1  ;;  %v2537_v24 = vmax.f32 %v3627_v0, 0.0  ;;  %v2405_v28 = vmax.f32 %v3495_v60, 0.0 }
 0x1aa   : > { %v2662_v11 = vadd.f32 %v2661_v58, %v2402_v56  ;;  %v2403_v7 = vmax.f32 %v1490_v1, 0.0  ;;  %v2535_v12 = vmax.f32 %v2018_v10, 0.0  ;;  %v2814_v20 = vadd.f32 %v2813_v3, %v2534_v61 }
 0x1ac   : > { %v2663_v23 = vadd.f32 %v2662_v11, %v2403_v7  ;;  %v2815_v27 = vadd.f32 %v2814_v20, %v2535_v12 }
 0x1ae   : > { %v2664_v29 = vadd.f32 %v2663_v23, %v2404_v19  ;;  %v3498_v30 = vpop.f32.mrb[40].mxu0  ;;  %v3630_v32 = vpop.f32.mrb[40].mxu1  ;;  %v2816_v36 = vadd.f32 %v2815_v27, %v2536_v15  ;;  %v2926_v23 = vld [vmem:[#allocation7 + $0x40] sm:$0xff]  ;;  %v2927_v27 = vld [vmem:[#allocation7 + $0x48] sm:$0xff] }
 0x1af   : > { %v1503_v35 = vpop.f32.mrb[41].mxu0  ;;  %v2031_v37 = vpop.f32.mrb[41].mxu1  ;;  %v2540_v58 = vmax.f32 %v3630_v32, 0.0  ;;  %v2408_v60 = vmax.f32 %v3498_v30, 0.0  ;;  %v3760_v32 = vpack.c.bf16 %v2927_v27, %v2926_v23 }
 0x1b0   : > { %v2406_v38 = vmax.f32 %v1503_v35, 0.0  ;;  %v2665_v40 = vadd.f32 %v2664_v29, %v2405_v28  ;;  %v3499_v41 = vpop.f32.mrb[42].mxu0  ;;  %v2538_v43 = vmax.f32 %v2031_v37, 0.0  ;;  %v3631_v45 = vpop.f32.mrb[42].mxu1  ;;  %v2817_v52 = vadd.f32 %v2816_v36, %v2537_v24 }
 0x1b1   : > { %v1506_v50 = vpop.f32.mrb[43].mxu0  ;;  %v2034_v51 = vpop.f32.mrb[43].mxu1  ;;  %v2541_v1 = vmax.f32 %v3631_v45, 0.0  ;;  %v2409_v10 = vmax.f32 %v3499_v41, 0.0  ;;  %3761 = vmatpush3.bf16.msra.mxu1 %v3760_v32 }
 0x1b2   : > { %v2666_v54 = vadd.f32 %v2665_v40, %v2406_v38  ;;  %v2407_v47 = vmax.f32 %v1506_v50, 0.0  ;;  %v2539_v56 = vmax.f32 %v2034_v51, 0.0  ;;  %v2818_v61 = vadd.f32 %v2817_v52, %v2538_v43  ;;  %3762 = vmatprep.subr.bf16.mxu1 %v4162_v42 }
 0x1b4   : > { %v2667_v0 = vadd.f32 %v2666_v54, %v2407_v47  ;;  %v2819_v3 = vadd.f32 %v2818_v61, %v2539_v56 }
 0x1b6   : > { %v2668_v11 = vadd.f32 %v2667_v0, %v2408_v60  ;;  %v3502_v7 = vpop.f32.mrb[44].mxu0  ;;  %v3634_v12 = vpop.f32.mrb[44].mxu1  ;;  %v2820_v20 = vadd.f32 %v2819_v3, %v2540_v58 }
 0x1b7   : > { %v1519_v15 = vpop.f32.mrb[45].mxu0  ;;  %v2047_v19 = vpop.f32.mrb[45].mxu1  ;;  %v2544_v45 = vmax.f32 %v3634_v12, 0.0  ;;  %v2412_v52 = vmax.f32 %v3502_v7, 0.0 }
 0x1b8   : > { %v2410_v24 = vmax.f32 %v1519_v15, 0.0  ;;  %v2669_v28 = vadd.f32 %v2668_v11, %v2409_v10  ;;  %v3503_v29 = vpop.f32.mrb[46].mxu0  ;;  %v2542_v35 = vmax.f32 %v2047_v19, 0.0  ;;  %v3635_v36 = vpop.f32.mrb[46].mxu1  ;;  %v2821_v30 = vadd.f32 %v2820_v20, %v2541_v1 }
 0x1b9   : > { %v1522_v37 = vpop.f32.mrb[47].mxu0  ;;  %v2050_v38 = vpop.f32.mrb[47].mxu1  ;;  %v2545_v54 = vmax.f32 %v3635_v36, 0.0  ;;  %v2413_v56 = vmax.f32 %v3503_v29, 0.0 }
 0x1ba   : > { %v2670_v40 = vadd.f32 %v2669_v28, %v2410_v24  ;;  %v2411_v43 = vmax.f32 %v1522_v37, 0.0  ;;  %v2543_v41 = vmax.f32 %v2050_v38, 0.0  ;;  %v2822_v50 = vadd.f32 %v2821_v30, %v2542_v35 }
 0x1bc   : > { %v2671_v51 = vadd.f32 %v2670_v40, %v2411_v43  ;;  %v2823_v47 = vadd.f32 %v2822_v50, %v2543_v41 }
 0x1be   : > { %v2672_v58 = vadd.f32 %v2671_v51, %v2412_v52  ;;  %v3506_v61 = vpop.f32.mrb[48].mxu0  ;;  %v3638_v60 = vpop.f32.mrb[48].mxu1  ;;  %v2824_v3 = vadd.f32 %v2823_v47, %v2544_v45 }
 0x1bf   : > { %v1535_v0 = vpop.f32.mrb[49].mxu0  ;;  %v2063_v1 = vpop.f32.mrb[49].mxu1  ;;  %v2548_v35 = vmax.f32 %v3638_v60, 0.0  ;;  %v2416_v29 = vmax.f32 %v3506_v61, 0.0 }
 0x1c0   : > { %v2414_v10 = vmax.f32 %v1535_v0, 0.0  ;;  %v2673_v11 = vadd.f32 %v2672_v58, %v2413_v56  ;;  %v3507_v15 = vpop.f32.mrb[50].mxu0  ;;  %v2546_v20 = vmax.f32 %v2063_v1, 0.0  ;;  %v3639_v19 = vpop.f32.mrb[50].mxu1  ;;  %v2825_v23 = vadd.f32 %v2824_v3, %v2545_v54 }
 0x1c1   : > { %v1538_v12 = vpop.f32.mrb[51].mxu0  ;;  %v2066_v27 = vpop.f32.mrb[51].mxu1  ;;  %v2549_v37 = vmax.f32 %v3639_v19, 0.0  ;;  %v2417_v38 = vmax.f32 %v3507_v15, 0.0 }
 0x1c2   : > { %v2674_v24 = vadd.f32 %v2673_v11, %v2414_v10  ;;  %v2415_v7 = vmax.f32 %v1538_v12, 0.0  ;;  %v2547_v28 = vmax.f32 %v2066_v27, 0.0  ;;  %v2826_v36 = vadd.f32 %v2825_v23, %v2546_v20 }
 0x1c4   : > { %v2675_v32 = vadd.f32 %v2674_v24, %v2415_v7  ;;  %v2827_v30 = vadd.f32 %v2826_v36, %v2547_v28 }
 0x1c6   : > { %v2676_v40 = vadd.f32 %v2675_v32, %v2416_v29  ;;  %v3510_v43 = vpop.f32.mrb[52].mxu0  ;;  %v3642_v41 = vpop.f32.mrb[52].mxu1  ;;  %v2828_v50 = vadd.f32 %v2827_v30, %v2548_v35 }
 0x1c7   : > { %v1551_v45 = vpop.f32.mrb[53].mxu0  ;;  %v2079_v52 = vpop.f32.mrb[53].mxu1  ;;  %v2552_v11 = vmax.f32 %v3642_v41, 0.0  ;;  %v2420_v15 = vmax.f32 %v3510_v43, 0.0 }
 0x1c8   : > { %v2418_v51 = vmax.f32 %v1551_v45, 0.0  ;;  %v2677_v47 = vadd.f32 %v2676_v40, %v2417_v38  ;;  %v3511_v54 = vpop.f32.mrb[54].mxu0  ;;  %v2550_v56 = vmax.f32 %v2079_v52, 0.0  ;;  %v3643_v58 = vpop.f32.mrb[54].mxu1  ;;  %v2829_v3 = vadd.f32 %v2828_v50, %v2549_v37 }
 0x1c9   : > { %v1554_v0 = vpop.f32.mrb[55].mxu0  ;;  %v2082_v60 = vpop.f32.mrb[55].mxu1  ;;  %v2553_v12 = vmax.f32 %v3643_v58, 0.0  ;;  %v2421_v27 = vmax.f32 %v3511_v54, 0.0 }
 0x1ca   : > { %v2678_v1 = vadd.f32 %v2677_v47, %v2418_v51  ;;  %v2419_v61 = vmax.f32 %v1554_v0, 0.0  ;;  %v2551_v10 = vmax.f32 %v2082_v60, 0.0  ;;  %v2830_v20 = vadd.f32 %v2829_v3, %v2550_v56 }
 0x1cc   : > { %v2679_v19 = vadd.f32 %v2678_v1, %v2419_v61  ;;  %v2831_v23 = vadd.f32 %v2830_v20, %v2551_v10  ;;  %v2929_v20 = vld [vmem:[#allocation7 + $0x58] sm:$0xff] }
 0x1ce   : > { %v2680_v24 = vadd.f32 %v2679_v19, %v2420_v15  ;;  %v3514_v7 = vpop.f32.mrb[56].mxu0  ;;  %v3646_v28 = vpop.f32.mrb[56].mxu1  ;;  %v2832_v36 = vadd.f32 %v2831_v23, %v2552_v11  ;;  %v2928_v11 = vld [vmem:[#allocation7 + $0x50] sm:$0xff]  ;;  %v2653_v15 = vrot.slane %v4567_v18, 4 }
 0x1cf   : > { %v1567_v35 = vpop.f32.mrb[57].mxu0  ;;  %v2095_v29 = vpop.f32.mrb[57].mxu1  ;;  %v2556_v47 = vmax.f32 %v3646_v28, 0.0  ;;  %v2424_v54 = vmax.f32 %v3514_v7, 0.0 }
 0x1d0   : > { %v2422_v32 = vmax.f32 %v1567_v35, 0.0  ;;  %v2681_v30 = vadd.f32 %v2680_v24, %v2421_v27  ;;  %v3515_v37 = vpop.f32.mrb[58].mxu0  ;;  %v2554_v38 = vmax.f32 %v2095_v29, 0.0  ;;  %v3647_v40 = vpop.f32.mrb[58].mxu1  ;;  %v2833_v50 = vadd.f32 %v2832_v36, %v2553_v12 }
 0x1d1   : > { %v1570_v45 = vpop.f32.mrb[59].mxu0  ;;  %v2098_v41 = vpop.f32.mrb[59].mxu1  ;;  %v2557_v0 = vmax.f32 %v3647_v40, 0.0  ;;  %v2425_v60 = vmax.f32 %v3515_v37, 0.0  ;;  %v3763_v27 = vpack.c.bf16 %v2929_v20, %v2928_v11 }
 0x1d2   : > { %v2682_v52 = vadd.f32 %v2681_v30, %v2422_v32  ;;  %v2423_v43 = vmax.f32 %v1570_v45, 0.0  ;;  %v2555_v51 = vmax.f32 %v2098_v41, 0.0  ;;  %v2834_v56 = vadd.f32 %v2833_v50, %v2554_v38 }
 0x1d3   : > { %3764 = vmatpush3.bf16.msra.mxu1 %v3763_v27  ;;  %v2654_v50 = vadd.f32 %v2653_v15, %v4567_v18 }
 0x1d4   : > { %v2683_v58 = vadd.f32 %v2682_v52, %v2423_v43  ;;  %v2835_v3 = vadd.f32 %v2834_v56, %v2555_v51  ;;  %3765 = vmatprep.subr.bf16.mxu1 %v4162_v42 }
 0x1d6   : > { %v2684_v1 = vadd.f32 %v2683_v58, %v2424_v54  ;;  %v3518_v61 = vpop.f32.mrb[60].mxu0  ;;  %v3650_v10 = vpop.f32.mrb[60].mxu1  ;;  %v2836_v12 = vadd.f32 %v2835_v3, %v2556_v47  ;;  %v2655_v3 = vrot.slane %v2654_v50, 2 }
 0x1d7   : > { %v1583_v19 = vpop.f32.mrb[61].mxu0  ;;  %v2111_v23 = vpop.f32.mrb[61].mxu1  ;;  %v2560_v40 = vmax.f32 %v3650_v10, 0.0  ;;  %v2428_v41 = vmax.f32 %v3518_v61, 0.0 }
 0x1d8   : > { %v2426_v24 = vmax.f32 %v1583_v19, 0.0  ;;  %v2685_v35 = vadd.f32 %v2684_v1, %v2425_v60  ;;  %v3519_v28 = vpop.f32.mrb[62].mxu0  ;;  %v2558_v36 = vmax.f32 %v2111_v23, 0.0  ;;  %v3651_v7 = vpop.f32.mrb[62].mxu1  ;;  %v4571_v32 = vadd.f32 %v2836_v12, %v2557_v0 }
 0x1d9   : > { %v1586_v29 = vpop.f32.mrb[63].mxu0  ;;  %v2114_v30 = vpop.f32.mrb[63].mxu1  ;;  %v2561_v43 = vmax.f32 %v3651_v7, 0.0  ;;  %v2429_v47 = vmax.f32 %v3519_v28, 0.0 }
 0x1da   : > { %v2686_v37 = vadd.f32 %v2685_v35, %v2426_v24  ;;  %v2427_v38 = vmax.f32 %v1586_v29, 0.0  ;;  %v2559_v45 = vmax.f32 %v2114_v30, 0.0 }
 0x1dc   : > { %v2687_v52 = vadd.f32 %v2686_v37, %v2427_v38  ;;  %v2844_v51 = vadd.f32 %v2559_v45, %v2558_v36  ;;  %v2656_v36 = vadd.f32 %v2655_v3, %v2654_v50 }
 0x1de   : > { %v2688_v56 = vadd.f32 %v2687_v52, %v2428_v41  ;;  %v3522_v54 = vpop.f32.mrb[64].mxu0  ;;  %v2845_v58 = vadd.f32 %v2844_v51, %v2560_v40  ;;  %v3654_v0 = vpop.f32.mrb[64].mxu1 }
 0x1df   : > { %v1599_v60 = vpop.f32.mrb[65].mxu0  ;;  %v2127_v1 = vpop.f32.mrb[65].mxu1  ;;  %v2564_v18 = vmax.f32 %v3654_v0, 0.0  ;;  %v2432_v29 = vmax.f32 %v3522_v54, 0.0 }
 0x1e0   : > { %v2689_v11 = vadd.f32 %v2688_v56, %v2429_v47  ;;  %v3523_v20 = vpop.f32.mrb[66].mxu0  ;;  %v2562_v10 = vmax.f32 %v2127_v1, 0.0  ;;  %v2846_v19 = vadd.f32 %v2845_v58, %v2561_v43  ;;  %v3655_v12 = vpop.f32.mrb[66].mxu1  ;;  %v2430_v23 = vmax.f32 %v1599_v60, 0.0 }
 0x1e1   : > { %v1602_v27 = vpop.f32.mrb[67].mxu0  ;;  %v2130_v61 = vpop.f32.mrb[67].mxu1  ;;  %v2565_v38 = vmax.f32 %v3655_v12, 0.0  ;;  %v2433_v45 = vmax.f32 %v3523_v20, 0.0  ;;  %v2657_v47 = vrot.slane %v2656_v36, 1 }
 0x1e2   : > { %v2690_v15 = vrot.slane %v2689_v11, 4  ;;  %v2431_v24 = vmax.f32 %v1602_v27, 0.0  ;;  %v2847_v35 = vadd.f32 %v2846_v19, %v2562_v10  ;;  %v2563_v28 = vmax.f32 %v2130_v61, 0.0 }
 0x1e4   : > { %v2691_v7 = vadd.f32 %v2690_v15, %v2689_v11  ;;  %v2696_v30 = vadd.f32 %v2431_v24, %v2430_v23  ;;  %v2848_v37 = vadd.f32 %v2847_v35, %v2563_v28  ;;  %v2658_v15 = vadd.f32 %v2657_v47, %v2656_v36 }
 0x1e6   : > { %v2692_v40 = vrot.slane %v2691_v7, 2  ;;  %v2697_v41 = vadd.f32 %v2696_v30, %v2432_v29  ;;  %v3526_v52 = vpop.f32.mrb[68].mxu0  ;;  %v2849_v43 = vadd.f32 %v2848_v37, %v2564_v18  ;;  %v3658_v51 = vpop.f32.mrb[68].mxu1 }
 0x1e7   : > { %v1615_v56 = vpop.f32.mrb[69].mxu0  ;;  %v2143_v58 = vpop.f32.mrb[69].mxu1  ;;  %v2568_v61 = vmax.f32 %v3658_v51, 0.0  ;;  %v2436_v35 = vmax.f32 %v3526_v52, 0.0 }
 0x1e8   : > { %v2693_v0 = vadd.f32 %v2692_v40, %v2691_v7  ;;  %v2434_v60 = vmax.f32 %v1615_v56, 0.0  ;;  %v2698_v1 = vadd.f32 %v2697_v41, %v2433_v45  ;;  %v3527_v10 = vpop.f32.mrb[70].mxu0  ;;  %v2566_v19 = vmax.f32 %v2143_v58, 0.0  ;;  %v3659_v50 = vpop.f32.mrb[70].mxu1 }
 0x1e9   : > { %v1618_v3 = vpop.f32.mrb[71].mxu0  ;;  %v2850_v54 = vadd.f32 %v2849_v43, %v2565_v38  ;;  %v2146_v11 = vpop.f32.mrb[71].mxu1  ;;  %v2569_v7 = vmax.f32 %v3659_v50, 0.0  ;;  %v2437_v37 = vmax.f32 %v3527_v10, 0.0 }
 0x1ea   : > { %v2694_v23 = vrot.slane %v2693_v0, 1  ;;  %v2699_v12 = vadd.f32 %v2698_v1, %v2434_v60  ;;  %v2435_v27 = vmax.f32 %v1618_v3, 0.0  ;;  %v2567_v20 = vmax.f32 %v2146_v11, 0.0 }
 0x1eb   : > { %v2851_v18 = vadd.f32 %v2850_v54, %v2566_v19 }
 0x1ec   : > { %v2695_v24 = vadd.f32 %v2694_v23, %v2693_v0  ;;  %v2700_v28 = vadd.f32 %v2699_v12, %v2435_v27 }
 0x1ed   : > { %v2852_v29 = vadd.f32 %v2851_v18, %v2567_v20 }
 0x1ee   : > { %v4575_v30 = vsel %vm2942_vm0, %v2695_v24, %v2658_v15  ;;  %v2701_v40 = vadd.f32 %v2700_v28, %v2436_v35  ;;  %v3530_v45 = vpop.f32.mrb[72].mxu0  ;;  %v3662_v38 = vpop.f32.mrb[72].mxu1 }
 0x1ef   : > { %v1631_v41 = vpop.f32.mrb[73].mxu0  ;;  %v2853_v43 = vadd.f32 %v2852_v29, %v2568_v61  ;;  %v2159_v56 = vpop.f32.mrb[73].mxu1  ;;  %v2572_v54 = vmax.f32 %v3662_v38, 0.0  ;;  %v2440_v10 = vmax.f32 %v3530_v45, 0.0 }
 0x1f0   : > { %v2438_v58 = vmax.f32 %v1631_v41, 0.0  ;;  %v2702_v60 = vadd.f32 %v2701_v40, %v2437_v37  ;;  %v3531_v1 = vpop.f32.mrb[74].mxu0  ;;  %v2570_v51 = vmax.f32 %v2159_v56, 0.0  ;;  %v3663_v19 = vpop.f32.mrb[74].mxu1 }
 0x1f1   : > { %v1634_v36 = vpop.f32.mrb[75].mxu0  ;;  %v2854_v47 = vadd.f32 %v2853_v43, %v2569_v7  ;;  %v2162_v52 = vpop.f32.mrb[75].mxu1  ;;  %v2573_v12 = vmax.f32 %v3663_v19, 0.0  ;;  %v2441_v20 = vmax.f32 %v3531_v1, 0.0 }
 0x1f2   : > { %v2703_v0 = vadd.f32 %v2702_v60, %v2438_v58  ;;  %v2439_v50 = vmax.f32 %v1634_v36, 0.0  ;;  %v2571_v3 = vmax.f32 %v2162_v52, 0.0 }
 0x1f3   : > { %v2855_v11 = vadd.f32 %v2854_v47, %v2570_v51 }
 0x1f4   : > { %v2704_v23 = vadd.f32 %v2703_v0, %v2439_v50 }
 0x1f5   : > { %v2856_v27 = vadd.f32 %v2855_v11, %v2571_v3 }
 0x1f6   : > { %v2705_v61 = vadd.f32 %v2704_v23, %v2440_v10  ;;  %v3534_v18 = vpop.f32.mrb[76].mxu0  ;;  %v3666_v15 = vpop.f32.mrb[76].mxu1 }
 0x1f7   : > { %v1647_v24 = vpop.f32.mrb[77].mxu0  ;;  %v2857_v35 = vadd.f32 %v2856_v27, %v2572_v54  ;;  %v2175_v28 = vpop.f32.mrb[77].mxu1  ;;  %v2576_v51 = vmax.f32 %v3666_v15, 0.0  ;;  %v2444_v1 = vmax.f32 %v3534_v18, 0.0 }
 0x1f8   : > { %v2442_v29 = vmax.f32 %v1647_v24, 0.0  ;;  %v2706_v37 = vadd.f32 %v2705_v61, %v2441_v20  ;;  %v3535_v7 = vpop.f32.mrb[78].mxu0  ;;  %v2574_v40 = vmax.f32 %v2175_v28, 0.0  ;;  %v3667_v41 = vpop.f32.mrb[78].mxu1 }
 0x1f9   : > { %v1650_v43 = vpop.f32.mrb[79].mxu0  ;;  %v2858_v56 = vadd.f32 %v2857_v35, %v2573_v12  ;;  %v2178_v38 = vpop.f32.mrb[79].mxu1  ;;  %v2577_v47 = vmax.f32 %v3667_v41, 0.0  ;;  %v2445_v0 = vmax.f32 %v3535_v7, 0.0 }
 0x1fa   : > { %v2707_v58 = vadd.f32 %v2706_v37, %v2442_v29  ;;  %v2443_v45 = vmax.f32 %v1650_v43, 0.0  ;;  %v2575_v60 = vmax.f32 %v2178_v38, 0.0 }
 0x1fb   : > { %v2859_v19 = vadd.f32 %v2858_v56, %v2574_v40 }
 0x1fc   : > { %v2708_v36 = vadd.f32 %v2707_v58, %v2443_v45 }
 0x1fd   : > { %v2860_v52 = vadd.f32 %v2859_v19, %v2575_v60 }
 0x1fe   : > { %v2709_v50 = vadd.f32 %v2708_v36, %v2444_v1  ;;  %v3538_v3 = vpop.f32.mrb[80].mxu0  ;;  %v3670_v54 = vpop.f32.mrb[80].mxu1 }
 0x1ff   : > { %v1663_v11 = vpop.f32.mrb[81].mxu0  ;;  %v2861_v10 = vadd.f32 %v2860_v52, %v2576_v51  ;;  %v2191_v23 = vpop.f32.mrb[81].mxu1  ;;  %v2580_v40 = vmax.f32 %v3670_v54, 0.0  ;;  %v2448_v7 = vmax.f32 %v3538_v3, 0.0 }
 0x200   : > { %v2446_v27 = vmax.f32 %v1663_v11, 0.0  ;;  %v2710_v20 = vadd.f32 %v2709_v50, %v2445_v0  ;;  %v3539_v12 = vpop.f32.mrb[82].mxu0  ;;  %v2578_v61 = vmax.f32 %v2191_v23, 0.0  ;;  %v3671_v24 = vpop.f32.mrb[82].mxu1 }
 0x201   : > { %v1666_v35 = vpop.f32.mrb[83].mxu0  ;;  %v2862_v28 = vadd.f32 %v2861_v10, %v2577_v47  ;;  %v2194_v15 = vpop.f32.mrb[83].mxu1  ;;  %v2581_v56 = vmax.f32 %v3671_v24, 0.0  ;;  %v2449_v58 = vmax.f32 %v3539_v12, 0.0 }
 0x202   : > { %v2711_v29 = vadd.f32 %v2710_v20, %v2446_v27  ;;  %v2447_v18 = vmax.f32 %v1666_v35, 0.0  ;;  %v2579_v37 = vmax.f32 %v2194_v15, 0.0  ;;  %v2931_v15 = vld [vmem:[#allocation7 + $0x68] sm:$0xff] }
 0x203   : > { %v2863_v41 = vadd.f32 %v2862_v28, %v2578_v61  ;;  %v2930_v28 = vld [vmem:[#allocation7 + $0x60] sm:$0xff] }
 0x204   : > { %v2712_v43 = vadd.f32 %v2711_v29, %v2447_v18  ;;  %v2932_v29 = vld [vmem:[#allocation7 + $0x70] sm:$0xff] }
 0x205   : > { %v2864_v38 = vadd.f32 %v2863_v41, %v2579_v37  ;;  %v2933_v41 = vld [vmem:[#allocation7 + $0x78] sm:$0xff] }
 0x206   : > { %v2713_v45 = vadd.f32 %v2712_v43, %v2448_v7  ;;  %v3542_v60 = vpop.f32.mrb[84].mxu0  ;;  %v3674_v51 = vpop.f32.mrb[84].mxu1  ;;  %v4164_v7 = vmov 0.0  }
 0x207   : > { %v1679_v19 = vpop.f32.mrb[85].mxu0  ;;  %v2865_v1 = vadd.f32 %v2864_v38, %v2580_v40  ;;  %v2207_v36 = vpop.f32.mrb[85].mxu1  ;;  %v2584_v61 = vmax.f32 %v3674_v51, 0.0  ;;  %v2452_v12 = vmax.f32 %v3542_v60, 0.0  ;;  %v3766_v40 = vpack.c.bf16 %v2931_v15, %v2930_v28  ;;  %3744 = vmatprep.mubr.msk.f32.mxu1 %vm4163_vm1, %v4164_v7 }
 0x208   : > { %v2450_v52 = vmax.f32 %v1679_v19, 0.0  ;;  %v2714_v0 = vadd.f32 %v2713_v45, %v2449_v58  ;;  %v3543_v47 = vpop.f32.mrb[86].mxu0  ;;  %v2582_v50 = vmax.f32 %v2207_v36, 0.0  ;;  %v3675_v11 = vpop.f32.mrb[86].mxu1  ;;  %v3769_v60 = vpack.c.bf16 %v2933_v41, %v2932_v29 }
 0x209   : > { %v1682_v10 = vpop.f32.mrb[87].mxu0  ;;  %v2866_v23 = vadd.f32 %v2865_v1, %v2581_v56  ;;  %v2210_v54 = vpop.f32.mrb[87].mxu1  ;;  %v2585_v18 = vmax.f32 %v3675_v11, 0.0  ;;  %v2453_v43 = vmax.f32 %v3543_v47, 0.0  ;;  %3767 = vmatpush3.bf16.msra.mxu1 %v3766_v40 }
 0x20a   : > { %v2715_v27 = vadd.f32 %v2714_v0, %v2450_v52  ;;  %v2451_v3 = vmax.f32 %v1682_v10, 0.0  ;;  %v2583_v20 = vmax.f32 %v2210_v54, 0.0  ;;  %3768 = vmatprep.subr.bf16.mxu1 %v4162_v42 }
 0x20b   : > { %v2867_v24 = vadd.f32 %v2866_v23, %v2582_v50 }
 0x20c   : > { %v2716_v35 = vadd.f32 %v2715_v27, %v2451_v3 }
 0x20d   : > { %v2868_v37 = vadd.f32 %v2867_v24, %v2583_v20  ;;  %3770 = vmatpush3.bf16.msra.mxu1 %v3769_v60 }
 0x20e   : > { %v2717_v56 = vadd.f32 %v2716_v35, %v2452_v12  ;;  %v3546_v38 = vpop.f32.mrb[88].mxu0  ;;  %v3678_v58 = vpop.f32.mrb[88].mxu1 }
 0x20f   : > { %v1695_v45 = vpop.f32.mrb[89].mxu0  ;;  %v2869_v19 = vadd.f32 %v2868_v37, %v2584_v61  ;;  %v2223_v51 = vpop.f32.mrb[89].mxu1  ;;  %v2588_v3 = vmax.f32 %v3678_v58, 0.0  ;;  %v2456_v61 = vmax.f32 %v3546_v38, 0.0 }
 0x210   : > { %v2454_v1 = vmax.f32 %v1695_v45, 0.0  ;;  %v2718_v36 = vadd.f32 %v2717_v56, %v2453_v43  ;;  %v3547_v52 = vpop.f32.mrb[90].mxu0  ;;  %v2586_v0 = vmax.f32 %v2223_v51, 0.0  ;;  %v3679_v50 = vpop.f32.mrb[90].mxu1 }
 0x211   : > { %v1698_v11 = vpop.f32.mrb[91].mxu0  ;;  %v2870_v10 = vadd.f32 %v2869_v19, %v2585_v18  ;;  %v2226_v23 = vpop.f32.mrb[91].mxu1  ;;  %v2589_v12 = vmax.f32 %v3679_v50, 0.0  ;;  %v2457_v28 = vmax.f32 %v3547_v52, 0.0 }
 0x212   : > { %v2719_v54 = vadd.f32 %v2718_v36, %v2454_v1  ;;  %v2455_v47 = vmax.f32 %v1698_v11, 0.0  ;;  %v2587_v27 = vmax.f32 %v2226_v23, 0.0 }
 0x213   : > { %v2871_v20 = vadd.f32 %v2870_v10, %v2586_v0 }
 0x214   : > { %v2720_v24 = vadd.f32 %v2719_v54, %v2455_v47 }
 0x215   : > { %v2872_v35 = vadd.f32 %v2871_v20, %v2587_v27 }
 0x216   : > { %v2721_v15 = vadd.f32 %v2720_v24, %v2456_v61  ;;  %v3550_v29 = vpop.f32.mrb[92].mxu0  ;;  %v3682_v37 = vpop.f32.mrb[92].mxu1 }
 0x217   : > { %v1711_v40 = vpop.f32.mrb[93].mxu0  ;;  %v2873_v41 = vadd.f32 %v2872_v35, %v2588_v3  ;;  %v2239_v42 = vpop.f32.mrb[93].mxu1  ;;  %v2592_v1 = vmax.f32 %v3682_v37, 0.0  ;;  %v2460_v52 = vmax.f32 %v3550_v29, 0.0 }
 0x218   : > { %v2458_v7 = vmax.f32 %v1711_v40, 0.0  ;;  %v2722_v18 = vadd.f32 %v2721_v15, %v2457_v28  ;;  %v3551_v43 = vpop.f32.mrb[94].mxu0  ;;  %v2590_v56 = vmax.f32 %v2239_v42, 0.0  ;;  %v3683_v45 = vpop.f32.mrb[94].mxu1 }
 0x219   : > { %v1714_v19 = vpop.f32.mrb[95].mxu0  ;;  %v4578_v58 = vadd.f32 %v2873_v41, %v2589_v12  ;;  %v2242_v51 = vpop.f32.mrb[95].mxu1  ;;  %v2593_v50 = vmax.f32 %v3683_v45, 0.0  ;;  %v2461_v10 = vmax.f32 %v3551_v43, 0.0 }
 0x21a   : > { %v2723_v38 = vadd.f32 %v2722_v18, %v2458_v7  ;;  %v2459_v60 = vmax.f32 %v1714_v19, 0.0  ;;  %v2591_v36 = vmax.f32 %v2242_v51, 0.0 }
 0x21c   : > { %v2724_v0 = vadd.f32 %v2723_v38, %v2459_v60  ;;  %v2881_v11 = vadd.f32 %v2591_v36, %v2590_v56 }
 0x21e   : > { %v2725_v23 = vadd.f32 %v2724_v0, %v2460_v52  ;;  %v3554_v54 = vpop.f32.mrb[96].mxu0  ;;  %v2882_v47 = vadd.f32 %v2881_v11, %v2592_v1  ;;  %v3686_v27 = vpop.f32.mrb[96].mxu1 }
 0x21f   : > { %v1727_v3 = vpop.f32.mrb[97].mxu0  ;;  %v2255_v20 = vpop.f32.mrb[97].mxu1  ;;  %v2596_v37 = vmax.f32 %v3686_v27, 0.0  ;;  %v2464_v56 = vmax.f32 %v3554_v54, 0.0 }
 0x220   : > { %v2726_v61 = vadd.f32 %v2725_v23, %v2461_v10  ;;  %v3555_v24 = vpop.f32.mrb[98].mxu0  ;;  %v2594_v12 = vmax.f32 %v2255_v20, 0.0  ;;  %v2883_v35 = vadd.f32 %v2882_v47, %v2593_v50  ;;  %v3687_v28 = vpop.f32.mrb[98].mxu1  ;;  %v2462_v15 = vmax.f32 %v1727_v3, 0.0 }
 0x221   : > { %v1730_v40 = vpop.f32.mrb[99].mxu0  ;;  %v2258_v41 = vpop.f32.mrb[99].mxu1  ;;  %v2597_v51 = vmax.f32 %v3687_v28, 0.0  ;;  %v2465_v60 = vmax.f32 %v3555_v24, 0.0 }
 0x222   : > { %v2727_v29 = vrot.slane %v2726_v61, 4  ;;  %v2463_v42 = vmax.f32 %v1730_v40, 0.0  ;;  %v2884_v7 = vadd.f32 %v2883_v35, %v2594_v12  ;;  %v2595_v18 = vmax.f32 %v2258_v41, 0.0 }
 0x224   : > { %v2728_v43 = vadd.f32 %v2727_v29, %v2726_v61  ;;  %v2733_v45 = vadd.f32 %v2463_v42, %v2462_v15  ;;  %v2885_v19 = vadd.f32 %v2884_v7, %v2595_v18 }
 0x226   : > { %v2729_v38 = vrot.slane %v2728_v43, 2  ;;  %v2734_v1 = vadd.f32 %v2733_v45, %v2464_v56  ;;  %v3558_v36 = vpop.f32.mrb[100].mxu0  ;;  %v2886_v52 = vadd.f32 %v2885_v19, %v2596_v37  ;;  %v3690_v0 = vpop.f32.mrb[100].mxu1 }
 0x227   : > { %v1743_v50 = vpop.f32.mrb[101].mxu0  ;;  %v2271_v11 = vpop.f32.mrb[101].mxu1  ;;  %v2600_v24 = vmax.f32 %v3690_v0, 0.0  ;;  %v2468_v29 = vmax.f32 %v3558_v36, 0.0 }
 0x228   : > { %v2730_v10 = vadd.f32 %v2729_v38, %v2728_v43  ;;  %v2466_v23 = vmax.f32 %v1743_v50, 0.0  ;;  %v2735_v47 = vadd.f32 %v2734_v1, %v2465_v60  ;;  %v3559_v27 = vpop.f32.mrb[102].mxu0  ;;  %v2598_v3 = vmax.f32 %v2271_v11, 0.0  ;;  %v3691_v20 = vpop.f32.mrb[102].mxu1 }
 0x229   : > { %v1746_v12 = vpop.f32.mrb[103].mxu0  ;;  %v2887_v61 = vadd.f32 %v2886_v52, %v2597_v51  ;;  %v2274_v54 = vpop.f32.mrb[103].mxu1  ;;  %v2601_v7 = vmax.f32 %v3691_v20, 0.0  ;;  %v2469_v43 = vmax.f32 %v3559_v27, 0.0 }
 0x22a   : > { %v2731_v35 = vrot.slane %v2730_v10, 1  ;;  %v2736_v15 = vadd.f32 %v2735_v47, %v2466_v23  ;;  %v2467_v28 = vmax.f32 %v1746_v12, 0.0  ;;  %v2599_v40 = vmax.f32 %v2274_v54, 0.0 }
 0x22b   : > { %v2888_v41 = vadd.f32 %v2887_v61, %v2598_v3 }
 0x22c   : > { %v2732_v37 = vadd.f32 %v2731_v35, %v2730_v10  ;;  %v2737_v42 = vadd.f32 %v2736_v15, %v2467_v28 }
 0x22d   : > { %v2889_v18 = vadd.f32 %v2888_v41, %v2599_v40 }
 0x22e   : > { %v2738_v56 = vadd.f32 %v2737_v42, %v2468_v29  ;;  %v3562_v45 = vpop.f32.mrb[104].mxu0  ;;  %v3694_v19 = vpop.f32.mrb[104].mxu1  ;;  %v4581_v38 = vsel %vm2944_vm2, %v2732_v37, %v4575_v30 }
 0x22f   : > { %v1759_v51 = vpop.f32.mrb[105].mxu0  ;;  %v2890_v60 = vadd.f32 %v2889_v18, %v2600_v24  ;;  %v2287_v1 = vpop.f32.mrb[105].mxu1  ;;  %v2604_v12 = vmax.f32 %v3694_v19, 0.0  ;;  %v2472_v54 = vmax.f32 %v3562_v45, 0.0 }
 0x230   : > { %v2470_v52 = vmax.f32 %v1759_v51, 0.0  ;;  %v2739_v50 = vadd.f32 %v2738_v56, %v2469_v43  ;;  %v3563_v0 = vpop.f32.mrb[106].mxu0  ;;  %v2602_v11 = vmax.f32 %v2287_v1, 0.0  ;;  %v3695_v23 = vpop.f32.mrb[106].mxu1 }
 0x231   : > { %v1762_v10 = vpop.f32.mrb[107].mxu0  ;;  %v2891_v36 = vadd.f32 %v2890_v60, %v2601_v7  ;;  %v2290_v47 = vpop.f32.mrb[107].mxu1  ;;  %v2605_v30 = vmax.f32 %v3695_v23, 0.0  ;;  %v2473_v28 = vmax.f32 %v3563_v0, 0.0 }
 0x232   : > { %v2740_v3 = vadd.f32 %v2739_v50, %v2470_v52  ;;  %v2471_v20 = vmax.f32 %v1762_v10, 0.0  ;;  %v2603_v27 = vmax.f32 %v2290_v47, 0.0 }
 0x233   : > { %v2892_v61 = vadd.f32 %v2891_v36, %v2602_v11 }
 0x234   : > { %v2741_v35 = vadd.f32 %v2740_v3, %v2471_v20 }
 0x235   : > { %v2893_v15 = vadd.f32 %v2892_v61, %v2603_v27 }
 0x236   : > { %v2742_v40 = vadd.f32 %v2741_v35, %v2472_v54  ;;  %v3566_v24 = vpop.f32.mrb[108].mxu0  ;;  %v3698_v41 = vpop.f32.mrb[108].mxu1 }
 0x237   : > { %v1775_v37 = vpop.f32.mrb[109].mxu0  ;;  %v2894_v29 = vadd.f32 %v2893_v15, %v2604_v12  ;;  %v2303_v42 = vpop.f32.mrb[109].mxu1  ;;  %v2608_v11 = vmax.f32 %v3698_v41, 0.0  ;;  %v2476_v0 = vmax.f32 %v3566_v24, 0.0 }
 0x238   : > { %v2474_v18 = vmax.f32 %v1775_v37, 0.0  ;;  %v2743_v43 = vadd.f32 %v2742_v40, %v2473_v28  ;;  %v3567_v7 = vpop.f32.mrb[110].mxu0  ;;  %v2606_v56 = vmax.f32 %v2303_v42, 0.0  ;;  %v3699_v51 = vpop.f32.mrb[110].mxu1 }
 0x239   : > { %v1778_v60 = vpop.f32.mrb[111].mxu0  ;;  %v2895_v1 = vadd.f32 %v2894_v29, %v2605_v30  ;;  %v2306_v19 = vpop.f32.mrb[111].mxu1  ;;  %v2609_v36 = vmax.f32 %v3699_v51, 0.0  ;;  %v2477_v3 = vmax.f32 %v3567_v7, 0.0 }
 0x23a   : > { %v2744_v52 = vadd.f32 %v2743_v43, %v2474_v18  ;;  %v2475_v45 = vmax.f32 %v1778_v60, 0.0  ;;  %v2607_v50 = vmax.f32 %v2306_v19, 0.0 }
 0x23b   : > { %v2896_v23 = vadd.f32 %v2895_v1, %v2606_v56 }
 0x23c   : > { %v2745_v10 = vadd.f32 %v2744_v52, %v2475_v45 }
 0x23d   : > { %v2897_v47 = vadd.f32 %v2896_v23, %v2607_v50 }
 0x23e   : > { %v2746_v20 = vadd.f32 %v2745_v10, %v2476_v0  ;;  %v3570_v27 = vpop.f32.mrb[112].mxu0  ;;  %v3702_v12 = vpop.f32.mrb[112].mxu1 }
 0x23f   : > { %v1791_v61 = vpop.f32.mrb[113].mxu0  ;;  %v2898_v54 = vadd.f32 %v2897_v47, %v2608_v11  ;;  %v2319_v35 = vpop.f32.mrb[113].mxu1  ;;  %v2612_v56 = vmax.f32 %v3702_v12, 0.0  ;;  %v2480_v7 = vmax.f32 %v3570_v27, 0.0 }
 0x240   : > { %v2478_v15 = vmax.f32 %v1791_v61, 0.0  ;;  %v2747_v28 = vadd.f32 %v2746_v20, %v2477_v3  ;;  %v3571_v30 = vpop.f32.mrb[114].mxu0  ;;  %v2610_v40 = vmax.f32 %v2319_v35, 0.0  ;;  %v3703_v37 = vpop.f32.mrb[114].mxu1 }
 0x241   : > { %v1794_v29 = vpop.f32.mrb[115].mxu0  ;;  %v2899_v42 = vadd.f32 %v2898_v54, %v2609_v36  ;;  %v2322_v41 = vpop.f32.mrb[115].mxu1  ;;  %v2613_v1 = vmax.f32 %v3703_v37, 0.0  ;;  %v2481_v52 = vmax.f32 %v3571_v30, 0.0 }
 0x242   : > { %v2748_v18 = vadd.f32 %v2747_v28, %v2478_v15  ;;  %v2479_v24 = vmax.f32 %v1794_v29, 0.0  ;;  %v2611_v43 = vmax.f32 %v2322_v41, 0.0 }
 0x243   : > { %v2900_v51 = vadd.f32 %v2899_v42, %v2610_v40 }
 0x244   : > { %v2749_v60 = vadd.f32 %v2748_v18, %v2479_v24 }
 0x245   : > { %v2901_v19 = vadd.f32 %v2900_v51, %v2611_v43 }
 0x246   : > { %v2750_v45 = vadd.f32 %v2749_v60, %v2480_v7  ;;  %v3574_v50 = vpop.f32.mrb[116].mxu0  ;;  %v3706_v11 = vpop.f32.mrb[116].mxu1 }
 0x247   : > { %v1807_v23 = vpop.f32.mrb[117].mxu0  ;;  %v2902_v0 = vadd.f32 %v2901_v19, %v2612_v56  ;;  %v2335_v10 = vpop.f32.mrb[117].mxu1  ;;  %v2616_v40 = vmax.f32 %v3706_v11, 0.0  ;;  %v2484_v30 = vmax.f32 %v3574_v50, 0.0 }
 0x248   : > { %v2482_v47 = vmax.f32 %v1807_v23, 0.0  ;;  %v2751_v3 = vadd.f32 %v2750_v45, %v2481_v52  ;;  %v3575_v36 = vpop.f32.mrb[118].mxu0  ;;  %v2614_v20 = vmax.f32 %v2335_v10, 0.0  ;;  %v3707_v61 = vpop.f32.mrb[118].mxu1 }
 0x249   : > { %v1810_v54 = vpop.f32.mrb[119].mxu0  ;;  %v2903_v35 = vadd.f32 %v2902_v0, %v2613_v1  ;;  %v2338_v12 = vpop.f32.mrb[119].mxu1  ;;  %v2617_v42 = vmax.f32 %v3707_v61, 0.0  ;;  %v2485_v18 = vmax.f32 %v3575_v36, 0.0 }
 0x24a   : > { %v2752_v15 = vadd.f32 %v2751_v3, %v2482_v47  ;;  %v2483_v27 = vmax.f32 %v1810_v54, 0.0  ;;  %v2615_v28 = vmax.f32 %v2338_v12, 0.0 }
 0x24b   : > { %v2904_v37 = vadd.f32 %v2903_v35, %v2614_v20 }
 0x24c   : > { %v2753_v29 = vadd.f32 %v2752_v15, %v2483_v27 }
 0x24d   : > { %v2905_v41 = vadd.f32 %v2904_v37, %v2615_v28 }
 0x24e   : > { %v2754_v24 = vadd.f32 %v2753_v29, %v2484_v30  ;;  %v3578_v43 = vpop.f32.mrb[120].mxu0  ;;  %v3710_v56 = vpop.f32.mrb[120].mxu1 }
 0x24f   : > { %v1823_v51 = vpop.f32.mrb[121].mxu0  ;;  %v2906_v7 = vadd.f32 %v2905_v41, %v2616_v40  ;;  %v2351_v60 = vpop.f32.mrb[121].mxu1  ;;  %v2620_v20 = vmax.f32 %v3710_v56, 0.0  ;;  %v2488_v36 = vmax.f32 %v3578_v43, 0.0 }
 0x250   : > { %v2486_v19 = vmax.f32 %v1823_v51, 0.0  ;;  %v2755_v52 = vadd.f32 %v2754_v24, %v2485_v18  ;;  %v3579_v1 = vpop.f32.mrb[122].mxu0  ;;  %v2618_v45 = vmax.f32 %v2351_v60, 0.0  ;;  %v3711_v23 = vpop.f32.mrb[122].mxu1 }
 0x251   : > { %v1826_v0 = vpop.f32.mrb[123].mxu0  ;;  %v2907_v10 = vadd.f32 %v2906_v7, %v2617_v42  ;;  %v2354_v11 = vpop.f32.mrb[123].mxu1  ;;  %v2621_v35 = vmax.f32 %v3711_v23, 0.0  ;;  %v2489_v15 = vmax.f32 %v3579_v1, 0.0 }
 0x252   : > { %v2756_v47 = vadd.f32 %v2755_v52, %v2486_v19  ;;  %v2487_v50 = vmax.f32 %v1826_v0, 0.0  ;;  %v2619_v3 = vmax.f32 %v2354_v11, 0.0 }
 0x253   : > { %v2908_v61 = vadd.f32 %v2907_v10, %v2618_v45 }
 0x254   : > { %v2757_v54 = vadd.f32 %v2756_v47, %v2487_v50 }
 0x255   : > { %v2909_v12 = vadd.f32 %v2908_v61, %v2619_v3 }
 0x256   : > { %v2758_v27 = vadd.f32 %v2757_v54, %v2488_v36  ;;  %v3582_v28 = vpop.f32.mrb[124].mxu0  ;;  %v2498_v54 = vmax.f32 %v4494_v63, 0.0 }
 0x257   : > { %v1839_v40 = vpop.f32.mrb[125].mxu0  ;;  %v2910_v37 = vadd.f32 %v2909_v12, %v2620_v20  ;;  %v2492_v7 = vmax.f32 %v3582_v28, 0.0 }
 0x258   : > { %v2490_v30 = vmax.f32 %v1839_v40, 0.0  ;;  %v2759_v29 = vadd.f32 %v2758_v27, %v2489_v15  ;;  %v3583_v41 = vpop.f32.mrb[126].mxu0  ;;  %v2499_v15 = vmax.f32 %v4500_v5, 0.0  ;;  %v2500_v40 = vmax.f32 %v4490_v59, 0.0 }
 0x259   : > { %v1842_v18 = vpop.f32.mrb[127].mxu0  ;;  %v4583_v42 = vadd.f32 %v2910_v37, %v2621_v35  ;;  %v2493_v60 = vmax.f32 %v3583_v41, 0.0  ;;  %v2504_v5 = vmax.f32 %v4502_v13, 0.0  ;;  %v2511_v13 = vmax.f32 %v4536_v8, 0.0 }
 0x25a   : > { %v2760_v24 = vadd.f32 %v2759_v29, %v2490_v30  ;;  %v2491_v51 = vmax.f32 %v1842_v18, 0.0  ;;  %v2501_v29 = vmax.f32 %v4497_v2, 0.0  ;;  %v2507_v2 = vmax.f32 %v4524_v49, 0.0 }
 0x25b   : > { %v2514_v49 = vmax.f32 %v4542_v26, 0.0  ;;  %v2518_v8 = vmax.f32 %v4552_v48, 0.0  ;;  %v2521_v26 = vmax.f32 %v4554_v53, 0.0  ;;  %v2525_v53 = vmax.f32 %v4562_v14, 0.0 }
 0x25c   : > { %v2761_v56 = vadd.f32 %v2760_v24, %v2491_v51  ;;  %v2502_v24 = vmax.f32 %v4506_v17, 0.0  ;;  %v2503_v51 = vmax.f32 %v4512_v25, 0.0  ;;  %v2509_v17 = vmax.f32 %v4521_v46, 0.0 }
 0x25d   : > { %v2510_v25 = vmax.f32 %v4531_v62, 0.0  ;;  %v2516_v46 = vmax.f32 %v4538_v21, 0.0  ;;  %v2517_v62 = vmax.f32 %v4545_v31, 0.0  ;;  %v2838_v21 = vrot.slane %v4571_v32, 4 }
 0x25e   : > { %v2762_v43 = vadd.f32 %v2761_v56, %v2492_v7  ;;  %v3586_v19 = vpop.f32.mrb[128].mxu0  ;;  %v2523_v31 = vmax.f32 %v4564_v16, 0.0 }
 0x25f   : > { %v1855_v52 = vpop.f32.mrb[129].mxu0  ;;  %v2496_v50 = vmax.f32 %v3586_v19, 0.0 }
 0x260   : > { %v2763_v45 = vadd.f32 %v2762_v43, %v2493_v60  ;;  %v3587_v1 = vpop.f32.mrb[130].mxu0  ;;  %v2494_v10 = vmax.f32 %v1855_v52, 0.0  ;;  %v2505_v60 = vmax.f32 %v4509_v22, 0.0  ;;  %v2506_v43 = vmax.f32 %v4518_v39, 0.0 }
 0x261   : > { %v1858_v23 = vpop.f32.mrb[131].mxu0  ;;  %v2497_v61 = vmax.f32 %v3587_v1, 0.0  ;;  %v2512_v22 = vmax.f32 %v4527_v57, 0.0  ;;  %v2513_v39 = vmax.f32 %v4534_v6, 0.0  ;;  %v2519_v57 = vmax.f32 %v4556_v55, 0.0 }
 0x262   : > { %v2764_v0 = vrot.slane %v2763_v45, 4  ;;  %v2495_v11 = vmax.f32 %v1858_v23, 0.0  ;;  %v2520_v6 = vmax.f32 %v4549_v44, 0.0  ;;  %v2524_v55 = vmax.f32 %v4558_v4, 0.0 }
 0x263   : > { %v2839_v44 = vadd.f32 %v2838_v21, %v4571_v32 }
 0x264   : > { %v2765_v47 = vadd.f32 %v2764_v0, %v2763_v45  ;;  %v2770_v3 = vadd.f32 %v2495_v11, %v2494_v10 }
 0x266   : > { %v2766_v20 = vrot.slane %v2765_v47, 2  ;;  %v2771_v36 = vadd.f32 %v2770_v3, %v2496_v50 }
 0x268   : > { %v2767_v35 = vadd.f32 %v2766_v20, %v2765_v47  ;;  %v2772_v12 = vadd.f32 %v2771_v36, %v2497_v61 }
 0x26a   : > { %v2768_v27 = vrot.slane %v2767_v35, 1  ;;  %v2773_v28 = vadd.f32 %v2772_v12, %v2498_v54 }
 0x26c   : > { %v2769_v37 = vadd.f32 %v2768_v27, %v2767_v35  ;;  %v2774_v30 = vadd.f32 %v2773_v28, %v2499_v15  ;;  %v2875_v15 = vrot.slane %v4578_v58, 4  ;;  %v2912_v27 = vrot.slane %v4583_v42, 4 }
 0x26e   : > { %v2775_v41 = vadd.f32 %v2774_v30, %v2500_v40  ;;  %v4590_v18 = vsel %vm2946_vm3, %v2769_v37, %v4581_v38  ;;  %v2508_v38 = vmax.f32 %v4514_v33, 0.0  ;;  %v2515_v33 = vmax.f32 %v4547_v34, 0.0 }
 0x26f   : > { %v2522_v34 = vmax.f32 %v4560_v9, 0.0  ;;  %v2876_v40 = vadd.f32 %v2875_v15, %v4578_v58  ;;  %v2913_v37 = vadd.f32 %v2912_v27, %v4583_v42 }
 0x270   : > { %v2776_v63 = vadd.f32 %v2775_v41, %v2501_v29  ;;  %v2840_v29 = vrot.slane %v2839_v44, 2 }
 0x271   : > { %v2877_v16 = vrot.slane %v2876_v40, 2 }
 0x272   : > { %v2777_v7 = vadd.f32 %v2776_v63, %v2502_v24  ;;  %v2914_v24 = vrot.slane %v2913_v37, 2 }
 0x274   : > { %v2778_v56 = vadd.f32 %v2777_v7, %v2503_v51  ;;  %v2841_v51 = vadd.f32 %v2840_v29, %v2839_v44  ;;  %v2878_v7 = vadd.f32 %v2877_v16, %v2876_v40  ;;  %v2915_v4 = vadd.f32 %v2914_v24, %v2913_v37 }
 0x276   : > { %v2779_v59 = vadd.f32 %v2778_v56, %v2504_v5  ;;  %v2879_v32 = vrot.slane %v2878_v7, 1 }
 0x278   : > { %v2780_v19 = vadd.f32 %v2779_v59, %v2505_v60  ;;  %v2842_v60 = vrot.slane %v2841_v51, 1  ;;  %v2916_v59 = vrot.slane %v2915_v4, 1 }
 0x27a   : > { %v2781_v52 = vadd.f32 %v2780_v19, %v2506_v43  ;;  %v2843_v42 = vadd.f32 %v2842_v60, %v2841_v51  ;;  %v2880_v43 = vadd.f32 %v2879_v32, %v2878_v7 }
 0x27c   : > { %v2782_v45 = vadd.f32 %v2781_v52, %v2507_v2  ;;  %v2917_v2 = vadd.f32 %v2916_v59, %v2915_v4 }
 0x27e   : > { %v2783_v1 = vadd.f32 %v2782_v45, %v2508_v38 }
 0x280   : > { %v2784_v23 = vadd.f32 %v2783_v1, %v2509_v17 }
 0x282   : > { %v2785_v0 = vadd.f32 %v2784_v23, %v2510_v25 }
 0x284   : > { %v2786_v10 = vadd.f32 %v2785_v0, %v2511_v13 }
 0x286   : > { %v2787_v11 = vadd.f32 %v2786_v10, %v2512_v22 }
 0x288   : > { %v2788_v47 = vadd.f32 %v2787_v11, %v2513_v39 }
 0x28a   : > { %v2789_v50 = vadd.f32 %v2788_v47, %v2514_v49 }
 0x28c   : > { %v2790_v3 = vadd.f32 %v2789_v50, %v2515_v33 }
 0x28e   : > { %v2791_v20 = vadd.f32 %v2790_v3, %v2516_v46 }
 0x290   : > { %v2792_v61 = vadd.f32 %v2791_v20, %v2517_v62 }
 0x292   : > { %v2793_v36 = vadd.f32 %v2792_v61, %v2518_v8 }
 0x294   : > { %v2794_v54 = vadd.f32 %v2793_v36, %v2519_v57 }
 0x296   : > { %v2795_v35 = vadd.f32 %v2794_v54, %v2520_v6 }
 0x298   : > { %v2796_v12 = vadd.f32 %v2795_v35, %v2521_v26 }
 0x29a   : > { %v2797_v48 = vadd.f32 %v2796_v12, %v2522_v34 }
 0x29c   : > { %v2798_v28 = vadd.f32 %v2797_v48, %v2523_v31 }
 0x29e   : > { %v2799_v9 = vadd.f32 %v2798_v28, %v2524_v55 }
 0x2a0   : > { %v2800_v30 = vadd.f32 %v2799_v9, %v2525_v53 }
 0x2a2   : > { %v2801_v41 = vrot.slane %v2800_v30, 4 }
 0x2a4   : > { %v2802_v63 = vadd.f32 %v2801_v41, %v2800_v30 }
 0x2a6   : > { %v2803_v5 = vrot.slane %v2802_v63, 2 }
 0x2a8   : > { %v2804_v56 = vadd.f32 %v2803_v5, %v2802_v63 }
 0x2aa   : > { %v2805_v14 = vrot.slane %v2804_v56, 1 }
 0x2ac   : > { %v2806_v58 = vadd.f32 %v2805_v14, %v2804_v56 }
 0x2ae   : > { %v2949_v19 = vsel %vm2948_vm4, %v2806_v58, %v4590_v18 }
 0x2af   : > { %v2951_v52 = vsel %vm2950_vm5, %v2843_v42, %v2949_v19 }
 0x2b0   : > { %v2953_v38 = vsel %vm2952_vm6, %v2880_v43, %v2951_v52 }
 0x2b1   : > { %v2955_v45 = vsel %vm2954_vm7, %v2917_v2, %v2953_v38 }
 0x2b2   : > { %3745 = vmatmul.mubr.f32.vlgmr.msra.gmra.mrb[124].mxu1 %v2955_v45 }
 0x385   : > { %v3023_v18 = vpop.f32.mrb[124].mxu1 }
 0x386   : > { %3027 = vst [vmem:[%s218_s20] sm:$0xff] %v3023_v18  ;;  %v3746_v17 = vpop.f32.mrb[125].mxu1 }
 0x387   : > { %4096 = shalt.err (!%p4093_p1)
}
 0x388   : > { %s4097_s24 = scalar_lea.hbm %s4630_s29, 128  ;;  %s4101_s4 = scalar_lea.hbm %s4675_s3, 256 }
 0x389   : > { %p4098_p13 = scmp.ne.s32.totalorder %s4630_s29, %s4097_s24  ;;  %p4102_p4 = scmp.lt.u32.totalorder %s4630_s29, %s4675_s3 }
 0x38a   : > { %p4103_p7 = scmp.lt.u32.totalorder %s4101_s4, %s4097_s24  ;;  %p4105_p11 = scmp.lt.u32.totalorder %s4097_s24, %s4630_s29 }
 0x38b   : > { %p4099_p6 = pnand %p4098_p13, %p4689_p0 }
 0x38c   : > { %p4104_p8 = por %p4103_p7, %p4102_p4 }
 0x38d   : > { %p4100_p10 = pneg %p4099_p6 }
 0x38e   : > { %p4106_p2 = por %p4105_p11, %p4104_p8 }
 0x390   : > { %p4107_p3 = pnand %p4106_p2, %p4100_p10 }
 0x392   : > { %4110 = shalt.err (!%p4107_p3)
}
 0x393   : > { %3797 = dma.vmem_to_hbm [thread:$0]  (%p4689_p0), %s4625_s7, 128, %s4630_s29, %s3029_s30  }
 0x394 PF: > { %s3054_s10 = sand.u32 1, %s4141_s12   ;;  %p4690_p5 = scmp.ne.s32.totalorder %s4680_s19, 0 }
 0x395   : > { %p4691_p9 = scmp.ge.s32.totalorder %s4153_s15, 2  ;;  %s3055_s18 = scalar_lea.sflag [#allocation4], %s3054_s10 }
 0x397   : > { %p3811_p12 = pnand %p4691_p9, %p4690_p5 }
 0x399   : > { %4136 = dma.done.wait (!%p3811_p12), %s3055_s18, 128  }
 0x39a   : > { %4138 = vsyncadd (!%p3811_p12), %s3055_s18, 4294967168  ;;  %p17_p1 = scmp.ge.s32.totalorder %s4299_s6, 4   ;;  %s4692_s12 = smov %s4145_s13 }
 0x39b   : > { %s4693_s13 = smov %s4149_s14  ;;  %s4694_s14 = smov %s4308_s11 }
 0x39c   : > { %s4695_s15 = smov %s4299_s6  ;;  %19 = sbr.rel (!%p17_p1) target bundleno = 6 (0x6), region = 85 }
 0x3a3   :  { %3060 = vsyncpa [#allocation3], 1 }
 0x3a4   :  { %3062 = vsyncpa [#allocation3 + $0x1], 1 }
 0x3a5   :  { %3063 = vsyncpa [#allocation6], 1 }
 0x3a6   :  { %3064 = vsyncpa [#allocation4], 1 }
 0x3a7   :  { %3066 = vsyncpa [#allocation4 + $0x1], 1 }

</bundles_post_ra>
